<compile_context>
chip_gen: v5e
topology: v5e:2x2
jax: 0.10.0
libtpu: 0.0.40
codegen_flags: <defaults>
</compile_context>

<pallas_src>
import functools
import math

import jax
import jax.numpy as jnp
from jax import lax
from jax.experimental import pallas as pl
from jax.experimental.pallas import tpu as pltpu

LANE = 128


def _round_up(x, m):
    return ((x + m - 1) // m) * m


def _block_bytes(shape, itemsize):
    """Approximate VMEM bytes of one block after (8,128) tiling."""
    if len(shape) == 1:
        return _round_up(shape[0], LANE) * itemsize
    lead = 1
    for d in shape[:-2]:
        lead *= d
    return lead * _round_up(shape[-2], 8) * _round_up(shape[-1], LANE) * itemsize


# ---------------------------------------------------------------------------
# Kernel A: BN1 (folded scale/shift) -> ReLU -> 1x1 conv  (+ BN2 partial stats)
# ---------------------------------------------------------------------------
def _bn_relu_conv1x1_kernel(x_ref, scale_ref, shift_ref, w_ref, b_ref,
                            mid_ref, sum_ref, sumsq_ref, *, TS, HW, mask_tail):
    # x_ref: (TS, Cin) f32 for one (batch, spatial tile).
    y = jnp.maximum(x_ref[...] * scale_ref[...] + shift_ref[...], 0.0)  # f32 VPU
    z = jnp.dot(y.astype(w_ref.dtype), w_ref[...],
                preferred_element_type=jnp.float32) + b_ref[...]        # (TS, Cmid_p)
    mid_ref[...] = z.astype(mid_ref.dtype)                              # bf16 store
    if mask_tail:
        # Spatial padding rows must not pollute the BN2 statistics.
        row = pl.program_id(1) * TS + lax.broadcasted_iota(jnp.int32, (TS, 1), 0)
        z = jnp.where(row < HW, z, 0.0)
    sum_ref[...] = jnp.sum(z, axis=0, keepdims=True)
    sumsq_ref[...] = jnp.sum(z * z, axis=0, keepdims=True)


# ---------------------------------------------------------------------------
# Kernel B: BN2 (folded scale/shift) -> ReLU -> 3x3 conv (stride 1, padding 1)
# ---------------------------------------------------------------------------
def _bn_relu_conv3x3_kernel(mid_ref, scale_ref, shift_ref, w_ref, b_ref,
                            o_ref, halo_ref, *, H, W, Wp, OFF, CHUNK, n_bands):
    c_out_p = o_ref.shape[-1]

    # Stage 1: BN2 + ReLU, cast once, into the zero-bordered 2-D halo buffer.
    # Layout: image pixel (y, x) -> halo row OFF + (y+1)*Wp + (x+1); everything
    # else (guard row, top/bottom border rows, left/right border columns) is 0.
    halo_ref[...] = jnp.zeros(halo_ref.shape, halo_ref.dtype)

    def fill_row(y, carry):
        src = y * W
        if W % 8 == 0:
            src = pl.multiple_of(src, 8)
        blk = mid_ref[pl.ds(src, W), :].astype(jnp.float32)
        act = jnp.maximum(blk * scale_ref[...] + shift_ref[...], 0.0)
        halo_ref[pl.ds(OFF + (y + 1) * Wp + 1, W), :] = act.astype(halo_ref.dtype)
        return carry

    lax.fori_loop(0, H, fill_row, 0)

    # Stage 2: 3x3 conv = 9 contiguous shifted loads -> MXU matmuls.  Border
    # (and width-padding) output columns are computed but discarded by the
    # wrapper, so no per-tap column masks are needed.
    def band(b, carry):
        out_start = b * CHUNK
        if CHUNK % 8 == 0:
            out_start = pl.multiple_of(out_start, 8)
        base = OFF + Wp + b * CHUNK
        acc = jnp.zeros((CHUNK, c_out_p), jnp.float32)
        tap = 0
        for dy in (-1, 0, 1):
            for dx in (-1, 0, 1):
                win = halo_ref[pl.ds(base + dy * Wp + dx, CHUNK), :]
                acc = acc + jnp.dot(win, w_ref[tap],
                                    preferred_element_type=jnp.float32)
                tap += 1
        o_ref[pl.ds(out_start, CHUNK), :] = (acc + b_ref[...]).astype(o_ref.dtype)
        return carry

    lax.fori_loop(0, n_bands, band, 0)


# ---------------------------------------------------------------------------
# Wrapper
# ---------------------------------------------------------------------------
@functools.partial(jax.jit, static_argnames=("eps", "matmul_dtype"))
def pruned_bottleneck_forward(x, best_in_planes, bn1_gamma, bn1_beta,
                              conv1_w, conv1_b, bn2_gamma, bn2_beta,
                              conv2_w, conv2_b, *, eps=1e-5,
                              matmul_dtype=jnp.bfloat16):
    N, _, H, W = x.shape
    HW = H * W
    c_mid = conv1_w.shape[0]      # 4 * out_planes
    c_sel = conv1_w.shape[1]      # len(bestInPlanes)
    c_out = conv2_w.shape[0]      # out_planes
    itm = jnp.dtype(matmul_dtype).itemsize

    # --- glue: channel index_select (identity for a fresh module) ----------
    x_sel = jnp.take(x, best_in_planes, axis=1)                 # (N, Csel, H, W)

    # --- layout glue: NCHW -> channels-last, flattened spatial -------------
    x_flat = jnp.transpose(x_sel, (0, 2, 3, 1)).reshape(N, HW, c_sel)
    x_flat = x_flat.astype(jnp.float32)

    # --- BN1 training-mode batch statistics (from x_flat, single extra pass)
    cnt = N * HW
    s1 = jnp.sum(x_flat, axis=(0, 1))
    s2 = jnp.sum(x_flat * x_flat, axis=(0, 1))
    mean1 = s1 / cnt
    var1 = jnp.maximum(s2 / cnt - mean1 * mean1, 0.0)   # clamp: cancellation guard
    scale1 = bn1_gamma / jnp.sqrt(var1 + eps)
    shift1 = bn1_beta - mean1 * scale1

    # lane-dense padding of the matmul-N / store channel dims
    c_mid_p = _round_up(c_mid, LANE)
    c_out_p = _round_up(c_out, LANE)

    w1 = conv1_w.reshape(c_mid, c_sel).T                          # (Csel, Cmid)
    w1 = jnp.pad(w1, ((0, 0), (0, c_mid_p - c_mid))).astype(matmul_dtype)
    b1 = jnp.pad(conv1_b, (0, c_mid_p - c_mid)).reshape(1, c_mid_p)
    b1 = b1.astype(jnp.float32)

    # --- kernel A spatial tiling (robust: pad HW, mask tail in-kernel) -----
    HW8 = _round_up(HW, 8)
    if HW8 <= 1024:
        TS = HW8
    else:
        TS, best_pad = 1024, None
        for ts in range(1024, 255, -8):
            padr = (-HW) % ts
            if best_pad is None or padr < best_pad:
                TS, best_pad = ts, padr
            if padr == 0:
                break
    HW_pad = _round_up(HW, TS)
    n_tiles = HW_pad // TS
    mask_tail = HW_pad != HW
    if mask_tail:
        x_flat = jnp.pad(x_flat, ((0, 0), (0, HW_pad - HW), (0, 0)))

    vmem_a = 2 * (_block_bytes((TS, c_sel), 4)
                  + 2 * _block_bytes((1, c_sel), 4)
                  + _block_bytes((c_sel, c_mid_p), itm)
                  + _block_bytes((1, c_mid_p), 4)
                  + _block_bytes((TS, c_mid_p), itm)
                  + 2 * _block_bytes((1, c_mid_p), 4))
    vmem_a = min(max(2 * vmem_a + (8 << 20), 32 << 20), 100 << 20)

    mid, part_sum, part_sumsq = pl.pallas_call(
        functools.partial(_bn_relu_conv1x1_kernel, TS=TS, HW=HW,
                          mask_tail=mask_tail),
        out_shape=(
            jax.ShapeDtypeStruct((N, HW_pad, c_mid_p), matmul_dtype),
            jax.ShapeDtypeStruct((N * n_tiles, 1, c_mid_p), jnp.float32),
            jax.ShapeDtypeStruct((N * n_tiles, 1, c_mid_p), jnp.float32),
        ),
        grid=(N, n_tiles),
        in_specs=[
            pl.BlockSpec((None, TS, c_sel), lambda n, s: (n, s, 0)),
            pl.BlockSpec((1, c_sel), lambda n, s: (0, 0)),
            pl.BlockSpec((1, c_sel), lambda n, s: (0, 0)),
            pl.BlockSpec((c_sel, c_mid_p), lambda n, s: (0, 0)),
            pl.BlockSpec((1, c_mid_p), lambda n, s: (0, 0)),
        ],
        out_specs=(
            pl.BlockSpec((None, TS, c_mid_p), lambda n, s: (n, s, 0)),
            pl.BlockSpec((None, 1, c_mid_p), lambda n, s: (n * n_tiles + s, 0, 0)),
            pl.BlockSpec((None, 1, c_mid_p), lambda n, s: (n * n_tiles + s, 0, 0)),
        ),
        compiler_params=pltpu.CompilerParams(
            dimension_semantics=("parallel", "parallel"),
            vmem_limit_bytes=vmem_a),
    )(x_flat,
      scale1.reshape(1, c_sel).astype(jnp.float32),
      shift1.reshape(1, c_sel).astype(jnp.float32),
      w1, b1)

    # --- BN2 batch statistics from the fused partial sums ------------------
    tot_sum = jnp.sum(part_sum[:, 0, :c_mid], axis=0)
    tot_sumsq = jnp.sum(part_sumsq[:, 0, :c_mid], axis=0)
    mean2 = tot_sum / cnt
    var2 = jnp.maximum(tot_sumsq / cnt - mean2 * mean2, 0.0)
    scale2 = bn2_gamma / jnp.sqrt(var2 + eps)
    shift2 = bn2_beta - mean2 * scale2
    scale2 = jnp.pad(scale2, (0, c_mid_p - c_mid)).reshape(1, c_mid_p)
    shift2 = jnp.pad(shift2, (0, c_mid_p - c_mid)).reshape(1, c_mid_p)
    scale2 = scale2.astype(jnp.float32)
    shift2 = shift2.astype(jnp.float32)

    # conv2 weight (Cout, Cmid, 3, 3) -> 9 taps of (Cmid_p, Cout_p)
    w2 = jnp.transpose(conv2_w, (2, 3, 1, 0)).reshape(9, c_mid, c_out)
    w2 = jnp.pad(w2, ((0, 0), (0, c_mid_p - c_mid), (0, c_out_p - c_out)))
    w2 = w2.astype(matmul_dtype)
    b2 = jnp.pad(conv2_b, (0, c_out_p - c_out)).reshape(1, c_out_p)
    b2 = b2.astype(jnp.float32)

    # --- kernel B band geometry: 2-D zero-bordered halo, width Wp = W + 2 --
    Wp = W + 2
    OFF = Wp                                     # guard row above the padded image
    cap = max(Wp, (32 * 8 * LANE) // c_out_p)    # keep f32 accumulator ~<=32 vregs
    cands = [br for br in range(1, H + 1) if br * Wp <= cap] or [1]
    BR = min(cands, key=lambda br: ((-H) % br, (br * Wp) % 8 != 0, -(br * Wp)))
    n_bands = -(-H // BR)
    HB = n_bands * BR                            # image rows incl. band overhang
    CHUNK = BR * Wp                              # matmul M dim per band (~256 target)
    HALO_ROWS = (HB + 4) * Wp

    vmem_b = (2 * (_block_bytes((HW_pad, c_mid_p), itm)
                   + 2 * _block_bytes((1, c_mid_p), 4)
                   + _block_bytes((9, c_mid_p, c_out_p), itm)
                   + _block_bytes((1, c_out_p), 4)
                   + _block_bytes((HB * Wp, c_out_p), itm))
              + _block_bytes((HALO_ROWS, c_mid_p), itm))
    vmem_b = min(max(2 * vmem_b + (8 << 20), 32 << 20), 100 << 20)

    out_p = pl.pallas_call(
        functools.partial(_bn_relu_conv3x3_kernel, H=H, W=W, Wp=Wp, OFF=OFF,
                          CHUNK=CHUNK, n_bands=n_bands),
        out_shape=jax.ShapeDtypeStruct((N, HB * Wp, c_out_p), matmul_dtype),
        grid=(N,),
        in_specs=[
            pl.BlockSpec((None, HW_pad, c_mid_p), lambda n: (n, 0, 0)),
            pl.BlockSpec((1, c_mid_p), lambda n: (0, 0)),
            pl.BlockSpec((1, c_mid_p), lambda n: (0, 0)),
            pl.BlockSpec((9, c_mid_p, c_out_p), lambda n: (0, 0, 0)),
            pl.BlockSpec((1, c_out_p), lambda n: (0, 0)),
        ],
        out_specs=pl.BlockSpec((None, HB * Wp, c_out_p), lambda n: (n, 0, 0)),
        scratch_shapes=[pltpu.VMEM((HALO_ROWS, c_mid_p), matmul_dtype)],
        compiler_params=pltpu.CompilerParams(
            dimension_semantics=("parallel",),
            vmem_limit_bytes=vmem_b),
    )(mid, scale2, shift2, w2, b2)

    # --- glue: strip width/lane padding, back to NCHW, concat with input ---
    out = out_p.reshape(N, HB, Wp, c_out_p)[:, :H, 1:W + 1, :c_out]
    out = jnp.transpose(out, (0, 3, 1, 2)).astype(x.dtype)
    return jnp.concatenate([x, out], axis=1)


# ---------------------------------------------------------------------------
# Pure-JAX reference of the same forward pass (for the sanity check)
# ---------------------------------------------------------------------------
def _reference(x, best_in_planes, bn1_gamma, bn1_beta, conv1_w, conv1_b,
               bn2_gamma, bn2_beta, conv2_w, conv2_b, eps=1e-5):
    x_sel = jnp.take(x, best_in_planes, axis=1)
    mean1 = jnp.mean(x_sel, axis=(0, 2, 3), keepdims=True)
    var1 = jnp.mean((x_sel - mean1) ** 2, axis=(0, 2, 3), keepdims=True)
    y = (x_sel - mean1) / jnp.sqrt(var1 + eps)
    y = y * bn1_gamma[None, :, None, None] + bn1_beta[None, :, None, None]
    y = jnp.maximum(y, 0.0)
    c_mid, c_sel = conv1_w.shape[0], conv1_w.shape[1]
    mid = jnp.einsum("nchw,oc->nohw", y, conv1_w.reshape(c_mid, c_sel),
                     precision=jax.lax.Precision.HIGHEST)
    mid = mid + conv1_b[None, :, None, None]
    mean2 = jnp.mean(mid, axis=(0, 2, 3), keepdims=True)
    var2 = jnp.mean((mid - mean2) ** 2, axis=(0, 2, 3), keepdims=True)
    z = (mid - mean2) / jnp.sqrt(var2 + eps)
    z = z * bn2_gamma[None, :, None, None] + bn2_beta[None, :, None, None]
    z = jnp.maximum(z, 0.0)
    out = jax.lax.conv_general_dilated(
        z, conv2_w, window_strides=(1, 1), padding=((1, 1), (1, 1)),
        dimension_numbers=("NCHW", "OIHW", "NCHW"),
        precision=jax.lax.Precision.HIGHEST)
    out = out + conv2_b[None, :, None, None]
    return jnp.concatenate([x, out], axis=1)


if __name__ == "__main__":
    key = jax.random.PRNGKey(0)
    N, in_planes, out_planes, H, W = 2, 4, 2, 16, 16
    c_mid = 4 * out_planes

    k_x, k_w1, k_b1, k_w2, k_b2 = jax.random.split(key, 5)
    x = jax.random.normal(k_x, (N, in_planes, H, W), dtype=jnp.float32)

    # Fresh-module parameters (PyTorch defaults): bestInPlanes = range(in_planes),
    # BN weight=1 / bias=0, conv1 uniform(+-1/sqrt(in_planes)), conv2 default
    # Conv2d init (uniform +-1/sqrt(fan_in)).
    best_in_planes = jnp.arange(in_planes, dtype=jnp.int32)
    bn1_gamma = jnp.ones((in_planes,), jnp.float32)
    bn1_beta = jnp.zeros((in_planes,), jnp.float32)
    stdv1 = 1.0 / math.sqrt(in_planes)
    conv1_w = jax.random.uniform(k_w1, (c_mid, in_planes, 1, 1), jnp.float32,
                                 -stdv1, stdv1)
    conv1_b = jax.random.uniform(k_b1, (c_mid,), jnp.float32, -stdv1, stdv1)
    bn2_gamma = jnp.ones((c_mid,), jnp.float32)
    bn2_beta = jnp.zeros((c_mid,), jnp.float32)
    stdv2 = 1.0 / math.sqrt(c_mid * 3 * 3)
    conv2_w = jax.random.uniform(k_w2, (out_planes, c_mid, 3, 3), jnp.float32,
                                 -stdv2, stdv2)
    conv2_b = jax.random.uniform(k_b2, (out_planes,), jnp.float32, -stdv2, stdv2)

    args = (x, best_in_planes, bn1_gamma, bn1_beta, conv1_w, conv1_b,
            bn2_gamma, bn2_beta, conv2_w, conv2_b)

    ref = _reference(*args)

    # Strict semantics check: f32 matmul path (tolerance covers fp reordering).
    out_f32 = jax.block_until_ready(
        pruned_bottleneck_forward(*args, matmul_dtype=jnp.float32))
    assert out_f32.shape == (N, in_planes + out_planes, H, W)
    assert jnp.allclose(out_f32, ref, atol=1e-3, rtol=1e-3), (
        float(jnp.max(jnp.abs(out_f32 - ref))))

    # Default perf path: bf16 operands / bf16 mid / bf16 output, f32 accumulate.
    out_bf16 = jax.block_until_ready(pruned_bottleneck_forward(*args))
    assert out_bf16.shape == (N, in_planes + out_planes, H, W)
    assert jnp.allclose(out_bf16, ref, atol=5e-2, rtol=5e-2), (
        float(jnp.max(jnp.abs(out_bf16 - ref))))

    print("KERNEL_OK")
</pallas_src>

<mosaic_0001>
module attributes {stable_mosaic.version = 11 : i64} {
  func.func @_bn_relu_conv1x1_kernel(%arg0: i32, %arg1: i32, %arg2: memref<1x256x4xf32, #tpu.memory_space<vmem>>, %arg3: memref<1x4xf32, #tpu.memory_space<vmem>>, %arg4: memref<1x4xf32, #tpu.memory_space<vmem>>, %arg5: memref<4x128xf32, #tpu.memory_space<vmem>>, %arg6: memref<1x128xf32, #tpu.memory_space<vmem>>, %arg7: memref<1x256x128xf32, #tpu.memory_space<vmem>>, %arg8: memref<1x1x128xf32, #tpu.memory_space<vmem>>, %arg9: memref<1x1x128xf32, #tpu.memory_space<vmem>>) attributes {dimension_semantics = [#tpu.dimension_semantics<parallel>, #tpu.dimension_semantics<parallel>], iteration_bounds = array<i64: 2, 1>, scalar_prefetch = 0 : i64, scratch_operands = 0 : i64, tpu.core_type = #tpu.core_type<tc>, window_params = [{transform_indices = @transform_0, window_bounds = array<i64: 1, 256, 4>}, {pipeline_mode = #tpu.pipeline_mode<synchronous>, transform_indices = @transform_1, window_bounds = array<i64: 1, 4>}, {pipeline_mode = #tpu.pipeline_mode<synchronous>, transform_indices = @transform_2, window_bounds = array<i64: 1, 4>}, {pipeline_mode = #tpu.pipeline_mode<synchronous>, transform_indices = @transform_3, window_bounds = array<i64: 4, 128>}, {pipeline_mode = #tpu.pipeline_mode<synchronous>, transform_indices = @transform_4, window_bounds = array<i64: 1, 128>}, {transform_indices = @transform_5, window_bounds = array<i64: 1, 256, 128>}, {transform_indices = @transform_6, window_bounds = array<i64: 1, 1, 128>}, {transform_indices = @transform_7, window_bounds = array<i64: 1, 1, 128>}]} {
    %c0 = arith.constant 0 : index
    %c0_0 = arith.constant 0 : index
    %c0_1 = arith.constant 0 : index
    %0 = vector.load %arg2[%c0, %c0_0, %c0_1] : memref<1x256x4xf32, #tpu.memory_space<vmem>>, vector<1x256x4xf32>
    %1 = vector.shape_cast %0 : vector<1x256x4xf32> to vector<256x4xf32>
    %c0_2 = arith.constant 0 : index
    %c0_3 = arith.constant 0 : index
    %2 = vector.load %arg3[%c0_2, %c0_3] : memref<1x4xf32, #tpu.memory_space<vmem>>, vector<1x4xf32>
    %3 = vector.broadcast %2 : vector<1x4xf32> to vector<256x4xf32>
    %4 = arith.mulf %1, %3 : vector<256x4xf32>
    %c0_4 = arith.constant 0 : index
    %c0_5 = arith.constant 0 : index
    %5 = vector.load %arg4[%c0_4, %c0_5] : memref<1x4xf32, #tpu.memory_space<vmem>>, vector<1x4xf32>
    %6 = vector.broadcast %5 : vector<1x4xf32> to vector<256x4xf32>
    %7 = arith.addf %4, %6 : vector<256x4xf32>
    %cst = arith.constant 0.000000e+00 : f32
    %8 = vector.broadcast %cst : f32 to vector<256x4xf32>
    %9 = arith.maximumf %7, %8 : vector<256x4xf32>
    %c0_6 = arith.constant 0 : index
    %c0_7 = arith.constant 0 : index
    %10 = vector.load %arg5[%c0_6, %c0_7] : memref<4x128xf32, #tpu.memory_space<vmem>>, vector<4x128xf32>
    %cst_8 = arith.constant dense<0.000000e+00> : vector<256x128xf32>
    %11 = tpu.matmul %9, %10, %cst_8 {dimension_numbers = #tpu.dot_dimension_numbers<[1], [0], [0], [1], [0, 0, 1, 1], [], []>} : vector<256x4xf32>, vector<4x128xf32>, vector<256x128xf32> -> vector<256x128xf32>
    %c0_9 = arith.constant 0 : index
    %c0_10 = arith.constant 0 : index
    %12 = vector.load %arg6[%c0_9, %c0_10] : memref<1x128xf32, #tpu.memory_space<vmem>>, vector<1x128xf32>
    %13 = vector.broadcast %12 : vector<1x128xf32> to vector<256x128xf32>
    %14 = arith.addf %11, %13 : vector<256x128xf32>
    %c0_11 = arith.constant 0 : index
    %c0_12 = arith.constant 0 : index
    %c0_13 = arith.constant 0 : index
    %15 = vector.load %arg7[%c0_11, %c0_12, %c0_13] : memref<1x256x128xf32, #tpu.memory_space<vmem>>, vector<1x256x128xf32>
    %16 = vector.shape_cast %15 : vector<1x256x128xf32> to vector<256x128xf32>
    %17 = vector.shape_cast %14 : vector<256x128xf32> to vector<1x256x128xf32>
    tpu.vector_store %arg7[%c0_11, %c0_12, %c0_13], %17 {strides = array<i32>} : memref<1x256x128xf32, #tpu.memory_space<vmem>>, vector<1x256x128xf32>,
    %cst_14 = arith.constant dense<0.000000e+00> : vector<128xf32>
    %18 = vector.multi_reduction <add>, %14, %cst_14 [0] : vector<256x128xf32> to vector<128xf32>
    %19 = vector.shape_cast %18 : vector<128xf32> to vector<1x128xf32>
    %c0_15 = arith.constant 0 : index
    %c0_16 = arith.constant 0 : index
    %c0_17 = arith.constant 0 : index
    %20 = vector.load %arg8[%c0_15, %c0_16, %c0_17] : memref<1x1x128xf32, #tpu.memory_space<vmem>>, vector<1x1x128xf32>
    %21 = vector.shape_cast %20 : vector<1x1x128xf32> to vector<1x128xf32>
    %22 = vector.shape_cast %19 : vector<1x128xf32> to vector<1x1x128xf32>
    tpu.vector_store %arg8[%c0_15, %c0_16, %c0_17], %22 {strides = array<i32>} : memref<1x1x128xf32, #tpu.memory_space<vmem>>, vector<1x1x128xf32>,
    %23 = arith.mulf %14, %14 : vector<256x128xf32>
    %cst_18 = arith.constant dense<0.000000e+00> : vector<128xf32>
    %24 = vector.multi_reduction <add>, %23, %cst_18 [0] : vector<256x128xf32> to vector<128xf32>
    %25 = vector.shape_cast %24 : vector<128xf32> to vector<1x128xf32>
    %c0_19 = arith.constant 0 : index
    %c0_20 = arith.constant 0 : index
    %c0_21 = arith.constant 0 : index
    %26 = vector.load %arg9[%c0_19, %c0_20, %c0_21] : memref<1x1x128xf32, #tpu.memory_space<vmem>>, vector<1x1x128xf32>
    %27 = vector.shape_cast %26 : vector<1x1x128xf32> to vector<1x128xf32>
    %28 = vector.shape_cast %25 : vector<1x128xf32> to vector<1x1x128xf32>
    tpu.vector_store %arg9[%c0_19, %c0_20, %c0_21], %28 {strides = array<i32>} : memref<1x1x128xf32, #tpu.memory_space<vmem>>, vector<1x1x128xf32>,
    return
  }
  func.func @transform_0(%arg0: i32, %arg1: i32) -> (i32, i32, i32) {
    %c0_i32 = arith.constant 0 : i32
    %c0_i32_0 = arith.constant 0 : i32
    return %arg0, %arg1, %c0_i32 : i32, i32, i32
  }
  func.func @transform_1(%arg0: i32, %arg1: i32) -> (i32, i32) {
    %c0_i32 = arith.constant 0 : i32
    %c0_i32_0 = arith.constant 0 : i32
    %c0_i32_1 = arith.constant 0 : i32
    return %c0_i32, %c0_i32_0 : i32, i32
  }
  func.func @transform_2(%arg0: i32, %arg1: i32) -> (i32, i32) {
    %c0_i32 = arith.constant 0 : i32
    %c0_i32_0 = arith.constant 0 : i32
    %c0_i32_1 = arith.constant 0 : i32
    return %c0_i32, %c0_i32_0 : i32, i32
  }
  func.func @transform_3(%arg0: i32, %arg1: i32) -> (i32, i32) {
    %c0_i32 = arith.constant 0 : i32
    %c0_i32_0 = arith.constant 0 : i32
    %c0_i32_1 = arith.constant 0 : i32
    return %c0_i32, %c0_i32_0 : i32, i32
  }
  func.func @transform_4(%arg0: i32, %arg1: i32) -> (i32, i32) {
    %c0_i32 = arith.constant 0 : i32
    %c0_i32_0 = arith.constant 0 : i32
    %c0_i32_1 = arith.constant 0 : i32
    return %c0_i32, %c0_i32_0 : i32, i32
  }
  func.func @transform_5(%arg0: i32, %arg1: i32) -> (i32, i32, i32) {
    %c0_i32 = arith.constant 0 : i32
    %c0_i32_0 = arith.constant 0 : i32
    return %arg0, %arg1, %c0_i32 : i32, i32, i32
  }
  func.func @transform_6(%arg0: i32, %arg1: i32) -> (i32, i32, i32) {
    %c1_i32 = arith.constant 1 : i32
    %0 = arith.muli %arg0, %c1_i32 : i32
    %1 = arith.addi %0, %arg1 : i32
    %c0_i32 = arith.constant 0 : i32
    %c0_i32_0 = arith.constant 0 : i32
    %c0_i32_1 = arith.constant 0 : i32
    return %1, %c0_i32, %c0_i32_0 : i32, i32, i32
  }
  func.func @transform_7(%arg0: i32, %arg1: i32) -> (i32, i32, i32) {
    %c1_i32 = arith.constant 1 : i32
    %0 = arith.muli %arg0, %c1_i32 : i32
    %1 = arith.addi %0, %arg1 : i32
    %c0_i32 = arith.constant 0 : i32
    %c0_i32_0 = arith.constant 0 : i32
    %c0_i32_1 = arith.constant 0 : i32
    return %1, %c0_i32, %c0_i32_0 : i32, i32, i32
  }
}

module attributes {stable_mosaic.version = 11 : i64} {
  func.func @_bn_relu_conv3x3_kernel(%arg0: i32, %arg1: memref<1x256x128xf32, #tpu.memory_space<vmem>>, %arg2: memref<1x128xf32, #tpu.memory_space<vmem>>, %arg3: memref<1x128xf32, #tpu.memory_space<vmem>>, %arg4: memref<9x128x128xf32, #tpu.memory_space<vmem>>, %arg5: memref<1x128xf32, #tpu.memory_space<vmem>>, %arg6: memref<1x288x128xf32, #tpu.memory_space<vmem>>, %arg7: memref<360x128xf32, #tpu.memory_space<vmem>>) attributes {dimension_semantics = [#tpu.dimension_semantics<parallel>], iteration_bounds = array<i64: 2>, scalar_prefetch = 0 : i64, scratch_operands = 1 : i64, tpu.core_type = #tpu.core_type<tc>, window_params = [{transform_indices = @transform_0, window_bounds = array<i64: 1, 256, 128>}, {pipeline_mode = #tpu.pipeline_mode<synchronous>, transform_indices = @transform_1, window_bounds = array<i64: 1, 128>}, {pipeline_mode = #tpu.pipeline_mode<synchronous>, transform_indices = @transform_2, window_bounds = array<i64: 1, 128>}, {pipeline_mode = #tpu.pipeline_mode<synchronous>, transform_indices = @transform_3, window_bounds = array<i64: 9, 128, 128>}, {pipeline_mode = #tpu.pipeline_mode<synchronous>, transform_indices = @transform_4, window_bounds = array<i64: 1, 128>}, {transform_indices = @transform_5, window_bounds = array<i64: 1, 288, 128>}]} {
    %cst = arith.constant 0.000000e+00 : f32
    %0 = vector.broadcast %cst : f32 to vector<360x128xf32>
    %c0 = arith.constant 0 : index
    %c0_0 = arith.constant 0 : index
    %1 = vector.load %arg7[%c0, %c0_0] : memref<360x128xf32, #tpu.memory_space<vmem>>, vector<360x128xf32>
    tpu.vector_store %arg7[%c0, %c0_0], %0 {strides = array<i32>} : memref<360x128xf32, #tpu.memory_space<vmem>>, vector<360x128xf32>,
    %c0_i32 = arith.constant 0 : i32
    %c16_i32 = arith.constant 16 : i32
    %2 = arith.addi %c0_i32, %c16_i32 : i32
    %c1_i32 = arith.constant 1 : i32
    scf.for %arg8 = %c0_i32 to %2 step %c1_i32  : i32 {
      %c16_i32_5 = arith.constant 16 : i32
      %4 = arith.muli %arg8, %c16_i32_5 : i32
      %5 = tpu.assume_multiple %4, 8 : i32
      %c0_6 = arith.constant 0 : index
      %6 = arith.index_cast %5 : i32 to index
      %c0_7 = arith.constant 0 : index
      %7 = vector.load %arg1[%c0_6, %6, %c0_7] : memref<1x256x128xf32, #tpu.memory_space<vmem>>, vector<1x16x128xf32>
      %8 = vector.shape_cast %7 : vector<1x16x128xf32> to vector<16x128xf32>
      %c0_8 = arith.constant 0 : index
      %c0_9 = arith.constant 0 : index
      %9 = vector.load %arg2[%c0_8, %c0_9] : memref<1x128xf32, #tpu.memory_space<vmem>>, vector<1x128xf32>
      %10 = vector.broadcast %9 : vector<1x128xf32> to vector<16x128xf32>
      %11 = arith.mulf %8, %10 : vector<16x128xf32>
      %c0_10 = arith.constant 0 : index
      %c0_11 = arith.constant 0 : index
      %12 = vector.load %arg3[%c0_10, %c0_11] : memref<1x128xf32, #tpu.memory_space<vmem>>, vector<1x128xf32>
      %13 = vector.broadcast %12 : vector<1x128xf32> to vector<16x128xf32>
      %14 = arith.addf %11, %13 : vector<16x128xf32>
      %cst_12 = arith.constant 0.000000e+00 : f32
      %15 = vector.broadcast %cst_12 : f32 to vector<16x128xf32>
      %16 = arith.maximumf %14, %15 : vector<16x128xf32>
      %c1_i32_13 = arith.constant 1 : i32
      %17 = arith.addi %arg8, %c1_i32_13 : i32
      %c18_i32 = arith.constant 18 : i32
      %18 = arith.muli %17, %c18_i32 : i32
      %c18_i32_14 = arith.constant 18 : i32
      %19 = arith.addi %c18_i32_14, %18 : i32
      %c1_i32_15 = arith.constant 1 : i32
      %20 = arith.addi %19, %c1_i32_15 : i32
      %21 = arith.index_cast %20 : i32 to index
      %c0_16 = arith.constant 0 : index
      %22 = vector.load %arg7[%21, %c0_16] : memref<360x128xf32, #tpu.memory_space<vmem>>, vector<16x128xf32>
      tpu.vector_store %arg7[%21, %c0_16], %16 {strides = array<i32>} : memref<360x128xf32, #tpu.memory_space<vmem>>, vector<16x128xf32>,
    }
    %c16_i32_1 = arith.constant 16 : i32
    %c0_i32_2 = arith.constant 0 : i32
    %c2_i32 = arith.constant 2 : i32
    %3 = arith.addi %c0_i32_2, %c2_i32 : i32
    %c1_i32_3 = arith.constant 1 : i32
    scf.for %arg8 = %c0_i32_2 to %3 step %c1_i32_3  : i32 {
      %c144_i32 = arith.constant 144 : i32
      %4 = arith.muli %arg8, %c144_i32 : i32
      %5 = tpu.assume_multiple %4, 8 : i32
      %c144_i32_5 = arith.constant 144 : i32
      %6 = arith.muli %arg8, %c144_i32_5 : i32
      %c36_i32 = arith.constant 36 : i32
      %7 = arith.addi %c36_i32, %6 : i32
      %cst_6 = arith.constant 0.000000e+00 : f32
      %8 = vector.broadcast %cst_6 : f32 to vector<144x128xf32>
      %c-18_i32 = arith.constant -18 : i32
      %9 = arith.addi %7, %c-18_i32 : i32
      %c-1_i32 = arith.constant -1 : i32
      %10 = arith.addi %9, %c-1_i32 : i32
      %11 = arith.index_cast %10 : i32 to index
      %c0_7 = arith.constant 0 : index
      %12 = vector.load %arg7[%11, %c0_7] : memref<360x128xf32, #tpu.memory_space<vmem>>, vector<144x128xf32>
      %c0_8 = arith.constant 0 : index
      %c0_9 = arith.constant 0 : index
      %c0_10 = arith.constant 0 : index
      %13 = vector.load %arg4[%c0_8, %c0_9, %c0_10] : memref<9x128x128xf32, #tpu.memory_space<vmem>>, vector<1x128x128xf32>
      %14 = vector.shape_cast %13 : vector<1x128x128xf32> to vector<128x128xf32>
      %cst_11 = arith.constant dense<0.000000e+00> : vector<144x128xf32>
      %15 = tpu.matmul %12, %14, %cst_11 {dimension_numbers = #tpu.dot_dimension_numbers<[1], [0], [0], [1], [0, 0, 1, 1], [], []>} : vector<144x128xf32>, vector<128x128xf32>, vector<144x128xf32> -> vector<144x128xf32>
      %16 = arith.addf %8, %15 : vector<144x128xf32>
      %c-18_i32_12 = arith.constant -18 : i32
      %17 = arith.addi %7, %c-18_i32_12 : i32
      %c0_i32_13 = arith.constant 0 : i32
      %18 = arith.addi %17, %c0_i32_13 : i32
      %19 = arith.index_cast %18 : i32 to index
      %c0_14 = arith.constant 0 : index
      %20 = vector.load %arg7[%19, %c0_14] : memref<360x128xf32, #tpu.memory_space<vmem>>, vector<144x128xf32>
      %c1 = arith.constant 1 : index
      %c0_15 = arith.constant 0 : index
      %c0_16 = arith.constant 0 : index
      %21 = vector.load %arg4[%c1, %c0_15, %c0_16] : memref<9x128x128xf32, #tpu.memory_space<vmem>>, vector<1x128x128xf32>
      %22 = vector.shape_cast %21 : vector<1x128x128xf32> to vector<128x128xf32>
      %cst_17 = arith.constant dense<0.000000e+00> : vector<144x128xf32>
      %23 = tpu.matmul %20, %22, %cst_17 {dimension_numbers = #tpu.dot_dimension_numbers<[1], [0], [0], [1], [0, 0, 1, 1], [], []>} : vector<144x128xf32>, vector<128x128xf32>, vector<144x128xf32> -> vector<144x128xf32>
      %24 = arith.addf %16, %23 : vector<144x128xf32>
      %c-18_i32_18 = arith.constant -18 : i32
      %25 = arith.addi %7, %c-18_i32_18 : i32
      %c1_i32_19 = arith.constant 1 : i32
      %26 = arith.addi %25, %c1_i32_19 : i32
      %27 = arith.index_cast %26 : i32 to index
      %c0_20 = arith.constant 0 : index
      %28 = vector.load %arg7[%27, %c0_20] : memref<360x128xf32, #tpu.memory_space<vmem>>, vector<144x128xf32>
      %c2 = arith.constant 2 : index
      %c0_21 = arith.constant 0 : index
      %c0_22 = arith.constant 0 : index
      %29 = vector.load %arg4[%c2, %c0_21, %c0_22] : memref<9x128x128xf32, #tpu.memory_space<vmem>>, vector<1x128x128xf32>
      %30 = vector.shape_cast %29 : vector<1x128x128xf32> to vector<128x128xf32>
      %cst_23 = arith.constant dense<0.000000e+00> : vector<144x128xf32>
      %31 = tpu.matmul %28, %30, %cst_23 {dimension_numbers = #tpu.dot_dimension_numbers<[1], [0], [0], [1], [0, 0, 1, 1], [], []>} : vector<144x128xf32>, vector<128x128xf32>, vector<144x128xf32> -> vector<144x128xf32>
      %32 = arith.addf %24, %31 : vector<144x128xf32>
      %c0_i32_24 = arith.constant 0 : i32
      %33 = arith.addi %7, %c0_i32_24 : i32
      %c-1_i32_25 = arith.constant -1 : i32
      %34 = arith.addi %33, %c-1_i32_25 : i32
      %35 = arith.index_cast %34 : i32 to index
      %c0_26 = arith.constant 0 : index
      %36 = vector.load %arg7[%35, %c0_26] : memref<360x128xf32, #tpu.memory_space<vmem>>, vector<144x128xf32>
      %c3 = arith.constant 3 : index
      %c0_27 = arith.constant 0 : index
      %c0_28 = arith.constant 0 : index
      %37 = vector.load %arg4[%c3, %c0_27, %c0_28] : memref<9x128x128xf32, #tpu.memory_space<vmem>>, vector<1x128x128xf32>
      %38 = vector.shape_cast %37 : vector<1x128x128xf32> to vector<128x128xf32>
      %cst_29 = arith.constant dense<0.000000e+00> : vector<144x128xf32>
      %39 = tpu.matmul %36, %38, %cst_29 {dimension_numbers = #tpu.dot_dimension_numbers<[1], [0], [0], [1], [0, 0, 1, 1], [], []>} : vector<144x128xf32>, vector<128x128xf32>, vector<144x128xf32> -> vector<144x128xf32>
      %40 = arith.addf %32, %39 : vector<144x128xf32>
      %c0_i32_30 = arith.constant 0 : i32
      %41 = arith.addi %7, %c0_i32_30 : i32
      %c0_i32_31 = arith.constant 0 : i32
      %42 = arith.addi %41, %c0_i32_31 : i32
      %43 = arith.index_cast %42 : i32 to index
      %c0_32 = arith.constant 0 : index
      %44 = vector.load %arg7[%43, %c0_32] : memref<360x128xf32, #tpu.memory_space<vmem>>, vector<144x128xf32>
      %c4 = arith.constant 4 : index
      %c0_33 = arith.constant 0 : index
      %c0_34 = arith.constant 0 : index
      %45 = vector.load %arg4[%c4, %c0_33, %c0_34] : memref<9x128x128xf32, #tpu.memory_space<vmem>>, vector<1x128x128xf32>
      %46 = vector.shape_cast %45 : vector<1x128x128xf32> to vector<128x128xf32>
      %cst_35 = arith.constant dense<0.000000e+00> : vector<144x128xf32>
      %47 = tpu.matmul %44, %46, %cst_35 {dimension_numbers = #tpu.dot_dimension_numbers<[1], [0], [0], [1], [0, 0, 1, 1], [], []>} : vector<144x128xf32>, vector<128x128xf32>, vector<144x128xf32> -> vector<144x128xf32>
      %48 = arith.addf %40, %47 : vector<144x128xf32>
      %c0_i32_36 = arith.constant 0 : i32
      %49 = arith.addi %7, %c0_i32_36 : i32
      %c1_i32_37 = arith.constant 1 : i32
      %50 = arith.addi %49, %c1_i32_37 : i32
      %51 = arith.index_cast %50 : i32 to index
      %c0_38 = arith.constant 0 : index
      %52 = vector.load %arg7[%51, %c0_38] : memref<360x128xf32, #tpu.memory_space<vmem>>, vector<144x128xf32>
      %c5 = arith.constant 5 : index
      %c0_39 = arith.constant 0 : index
      %c0_40 = arith.constant 0 : index
      %53 = vector.load %arg4[%c5, %c0_39, %c0_40] : memref<9x128x128xf32, #tpu.memory_space<vmem>>, vector<1x128x128xf32>
      %54 = vector.shape_cast %53 : vector<1x128x128xf32> to vector<128x128xf32>
      %cst_41 = arith.constant dense<0.000000e+00> : vector<144x128xf32>
      %55 = tpu.matmul %52, %54, %cst_41 {dimension_numbers = #tpu.dot_dimension_numbers<[1], [0], [0], [1], [0, 0, 1, 1], [], []>} : vector<144x128xf32>, vector<128x128xf32>, vector<144x128xf32> -> vector<144x128xf32>
      %56 = arith.addf %48, %55 : vector<144x128xf32>
      %c18_i32 = arith.constant 18 : i32
      %57 = arith.addi %7, %c18_i32 : i32
      %c-1_i32_42 = arith.constant -1 : i32
      %58 = arith.addi %57, %c-1_i32_42 : i32
      %59 = arith.index_cast %58 : i32 to index
      %c0_43 = arith.constant 0 : index
      %60 = vector.load %arg7[%59, %c0_43] : memref<360x128xf32, #tpu.memory_space<vmem>>, vector<144x128xf32>
      %c6 = arith.constant 6 : index
      %c0_44 = arith.constant 0 : index
      %c0_45 = arith.constant 0 : index
      %61 = vector.load %arg4[%c6, %c0_44, %c0_45] : memref<9x128x128xf32, #tpu.memory_space<vmem>>, vector<1x128x128xf32>
      %62 = vector.shape_cast %61 : vector<1x128x128xf32> to vector<128x128xf32>
      %cst_46 = arith.constant dense<0.000000e+00> : vector<144x128xf32>
      %63 = tpu.matmul %60, %62, %cst_46 {dimension_numbers = #tpu.dot_dimension_numbers<[1], [0], [0], [1], [0, 0, 1, 1], [], []>} : vector<144x128xf32>, vector<128x128xf32>, vector<144x128xf32> -> vector<144x128xf32>
      %64 = arith.addf %56, %63 : vector<144x128xf32>
      %c18_i32_47 = arith.constant 18 : i32
      %65 = arith.addi %7, %c18_i32_47 : i32
      %c0_i32_48 = arith.constant 0 : i32
      %66 = arith.addi %65, %c0_i32_48 : i32
      %67 = arith.index_cast %66 : i32 to index
      %c0_49 = arith.constant 0 : index
      %68 = vector.load %arg7[%67, %c0_49] : memref<360x128xf32, #tpu.memory_space<vmem>>, vector<144x128xf32>
      %c7 = arith.constant 7 : index
      %c0_50 = arith.constant 0 : index
      %c0_51 = arith.constant 0 : index
      %69 = vector.load %arg4[%c7, %c0_50, %c0_51] : memref<9x128x128xf32, #tpu.memory_space<vmem>>, vector<1x128x128xf32>
      %70 = vector.shape_cast %69 : vector<1x128x128xf32> to vector<128x128xf32>
      %cst_52 = arith.constant dense<0.000000e+00> : vector<144x128xf32>
      %71 = tpu.matmul %68, %70, %cst_52 {dimension_numbers = #tpu.dot_dimension_numbers<[1], [0], [0], [1], [0, 0, 1, 1], [], []>} : vector<144x128xf32>, vector<128x128xf32>, vector<144x128xf32> -> vector<144x128xf32>
      %72 = arith.addf %64, %71 : vector<144x128xf32>
      %c18_i32_53 = arith.constant 18 : i32
      %73 = arith.addi %7, %c18_i32_53 : i32
      %c1_i32_54 = arith.constant 1 : i32
      %74 = arith.addi %73, %c1_i32_54 : i32
      %75 = arith.index_cast %74 : i32 to index
      %c0_55 = arith.constant 0 : index
      %76 = vector.load %arg7[%75, %c0_55] : memref<360x128xf32, #tpu.memory_space<vmem>>, vector<144x128xf32>
      %c8 = arith.constant 8 : index
      %c0_56 = arith.constant 0 : index
      %c0_57 = arith.constant 0 : index
      %77 = vector.load %arg4[%c8, %c0_56, %c0_57] : memref<9x128x128xf32, #tpu.memory_space<vmem>>, vector<1x128x128xf32>
      %78 = vector.shape_cast %77 : vector<1x128x128xf32> to vector<128x128xf32>
      %cst_58 = arith.constant dense<0.000000e+00> : vector<144x128xf32>
      %79 = tpu.matmul %76, %78, %cst_58 {dimension_numbers = #tpu.dot_dimension_numbers<[1], [0], [0], [1], [0, 0, 1, 1], [], []>} : vector<144x128xf32>, vector<128x128xf32>, vector<144x128xf32> -> vector<144x128xf32>
      %80 = arith.addf %72, %79 : vector<144x128xf32>
      %c0_59 = arith.constant 0 : index
      %c0_60 = arith.constant 0 : index
      %81 = vector.load %arg5[%c0_59, %c0_60] : memref<1x128xf32, #tpu.memory_space<vmem>>, vector<1x128xf32>
      %82 = vector.broadcast %81 : vector<1x128xf32> to vector<144x128xf32>
      %83 = arith.addf %80, %82 : vector<144x128xf32>
      %c0_61 = arith.constant 0 : index
      %84 = arith.index_cast %5 : i32 to index
      %c0_62 = arith.constant 0 : index
      %85 = vector.load %arg6[%c0_61, %84, %c0_62] : memref<1x288x128xf32, #tpu.memory_space<vmem>>, vector<1x144x128xf32>
      %86 = vector.shape_cast %85 : vector<1x144x128xf32> to vector<144x128xf32>
      %87 = vector.shape_cast %83 : vector<144x128xf32> to vector<1x144x128xf32>
      tpu.vector_store %arg6[%c0_61, %84, %c0_62], %87 {strides = array<i32>} : memref<1x288x128xf32, #tpu.memory_space<vmem>>, vector<1x144x128xf32>,
    }
    %c2_i32_4 = arith.constant 2 : i32
    return
  }
  func.func @transform_0(%arg0: i32) -> (i32, i32, i32) {
    %c0_i32 = arith.constant 0 : i32
    %c0_i32_0 = arith.constant 0 : i32
    %c0_i32_1 = arith.constant 0 : i32
    return %arg0, %c0_i32, %c0_i32_0 : i32, i32, i32
  }
  func.func @transform_1(%arg0: i32) -> (i32, i32) {
    %c0_i32 = arith.constant 0 : i32
    %c0_i32_0 = arith.constant 0 : i32
    %c0_i32_1 = arith.constant 0 : i32
    return %c0_i32, %c0_i32_0 : i32, i32
  }
  func.func @transform_2(%arg0: i32) -> (i32, i32) {
    %c0_i32 = arith.constant 0 : i32
    %c0_i32_0 = arith.constant 0 : i32
    %c0_i32_1 = arith.constant 0 : i32
    return %c0_i32, %c0_i32_0 : i32, i32
  }
  func.func @transform_3(%arg0: i32) -> (i32, i32, i32) {
    %c0_i32 = arith.constant 0 : i32
    %c0_i32_0 = arith.constant 0 : i32
    %c0_i32_1 = arith.constant 0 : i32
    %c0_i32_2 = arith.constant 0 : i32
    return %c0_i32, %c0_i32_0, %c0_i32_1 : i32, i32, i32
  }
  func.func @transform_4(%arg0: i32) -> (i32, i32) {
    %c0_i32 = arith.constant 0 : i32
    %c0_i32_0 = arith.constant 0 : i32
    %c0_i32_1 = arith.constant 0 : i32
    return %c0_i32, %c0_i32_0 : i32, i32
  }
  func.func @transform_5(%arg0: i32) -> (i32, i32, i32) {
    %c0_i32 = arith.constant 0 : i32
    %c0_i32_0 = arith.constant 0 : i32
    %c0_i32_1 = arith.constant 0 : i32
    return %arg0, %c0_i32, %c0_i32_0 : i32, i32, i32
  }
}

</mosaic_0001>

<bundles_post_ra>
// kernel: pruned_bottleneck_forward.2
= control target key start
LH: loop header
LB: loop body
LE: loop exit
PB: predicated region body
PF: predicated region fallthrough
CT: control target
= control target key end

     0   :  { %s1123_s24 = smov 0   ;;  %s1125_s25 = smov 0   ;;  %s1511_s0 = inlined_call_operand.vmem [shape: f32[2,256,4], index: 0, kind: input, shape index: {}]   ;;  %s1512_s1 = inlined_call_operand.vmem [shape: f32[1,4], index: 1, kind: input, shape index: {}]   ;;  %s1513_s2 = inlined_call_operand.vmem [shape: f32[1,4], index: 2, kind: input, shape index: {}]   ;;  %s1514_s3 = inlined_call_operand.vmem [shape: f32[4,128], index: 3, kind: input, shape index: {}]   ;;  %s1515_s4 = inlined_call_operand.vmem [shape: f32[1,128], index: 4, kind: input, shape index: {}]   ;;  %s1516_s5 = inlined_call_operand.vmem [shape: f32[2,256,128], index: 5, kind: output, shape index: {0}]   ;;  %s1517_s6 = inlined_call_operand.vmem [shape: f32[2,1,128], index: 6, kind: output, shape index: {1}]   ;;  %s1518_s7 = inlined_call_operand.vmem [shape: f32[2,1,128], index: 7, kind: output, shape index: {2}]  }
   0x1   :  { %s1127_s26 = smov 0  }
   0x2 LB: > { %s30_s27 = sadd.s32 1, %s1077_s25  ;;  %p987_p0 = scmp.ge.s32.totalorder %s1081_s26, 1  ;;  %s1081_s26 = sphi %s1127_s26, %s18_s26   ;;  %s1077_s25 = sphi %s1125_s25, %s1520_s25   ;;  %s1073_s24 = sphi %s1123_s24, %s1519_s24  }
   0x3   : > { %p32_p1 = scmp.ge.s32.totalorder %s30_s27, 2  ;;  %p267_p2 = scmp.lt.s32.totalorder %s1081_s26, 3 }
   0x5   : > { %s1522_s27 = smov (%p32_p1, %s30_s27), 0  ;;  %p268_p3 = pnand %p987_p0, %p267_p2 }
   0x6   : > { %p316_p4 = scmp.lt.s32.totalorder (!%p268_p3), %s1073_s24, 1 }
   0x7   : > { %271 = sbr.rel (%p268_p3) target bundleno = 271 (0x10f), region = 40 }
   0xc   : > { %v481_v0 = vld [vmem:[%s1514_s3] sm:$0xf]  ;;  %vm583_vm0 = vcmask 1043456   ;;  %s1524_s24 = smov (!%p316_p4, %s1073_s24), 1  ;;  %vm486_vm1 = vcmask 31744  }
   0xd   : > { %992 = vmatpush.msk.msra.mxu0 %vm583_vm0, %v481_v0  ;;  %1029 = vmatpush.msk.msra.mxu1 %vm583_vm0, %v481_v0  ;;  %v1149_v1 = vld [vmem:[%s1512_s1] ss:$0 sm:$0xff]  ;;  %s1027_s9 = sshll.u32 %s1524_s24, 8  ;;  %s338_s22 = scalar_lea.vmem %s1517_s6, %s1524_s24 }
   0xe   : > { %1030 = vmatpush.msk.msra.mxu2 %vm583_vm0, %v481_v0  ;;  %1031 = vmatpush.msk.msra.mxu3 %vm583_vm0, %v481_v0  ;;  %s1157_s12 = scalar_lea.vmem %s1511_s0, %s1027_s9  ;;  %v1162_v2 = vld [vmem:[%s1513_s2] ss:$0 sm:$0xff]  ;;  %s1302_s19 = scalar_lea.vmem %s1516_s5, %s1027_s9 }
   0xf   : > { %v345_v3 = vld [vmem:[%s1157_s12] sm:$0xff]  ;;  %v346_v4 = vld [vmem:[%s1157_s12 + $0x8] sm:$0xff]  ;;  %v347_v22 = vld [vmem:[%s1157_s12 + $0x10] sm:$0xff]  ;;  %s343_s29 = scalar_lea.vmem %s1518_s7, %s1524_s24 }
  0x10   : > { %v381_v5 = vmul.f32 %v1149_v1, %v345_v3  ;;  %v353_v6 = vld [vmem:[%s1157_s12 + $0x40] sm:$0xff]  ;;  %v354_v7 = vld [vmem:[%s1157_s12 + $0x48] sm:$0xff]  ;;  %v382_v11 = vmul.f32 %v1149_v1, %v346_v4  ;;  %v355_v24 = vld [vmem:[%s1157_s12 + $0x50] sm:$0xff]  ;;  %v383_v29 = vmul.f32 %v1149_v1, %v347_v22 }
  0x11   : > { %v389_v8 = vmul.f32 %v1149_v1, %v353_v6  ;;  %v361_v9 = vld [vmem:[%s1157_s12 + $0x80] sm:$0xff]  ;;  %v390_v14 = vmul.f32 %v1149_v1, %v354_v7  ;;  %v362_v15 = vld [vmem:[%s1157_s12 + $0x88] sm:$0xff]  ;;  %v363_v26 = vld [vmem:[%s1157_s12 + $0x90] sm:$0xff]  ;;  %v391_v31 = vmul.f32 %v1149_v1, %v355_v24 }
  0x12   : > { %v417_v10 = vadd.f32 %v1162_v2, %v381_v5  ;;  %v397_v12 = vmul.f32 %v1149_v1, %v361_v9  ;;  %v418_v19 = vadd.f32 %v1162_v2, %v382_v11  ;;  %v398_v21 = vmul.f32 %v1149_v1, %v362_v15  ;;  %v369_v27 = vld [vmem:[%s1157_s12 + $0xc0] sm:$0xff]  ;;  %v348_v37 = vld [vmem:[%s1157_s12 + $0x18] sm:$0xff]  ;;  %v370_v43 = vld [vmem:[%s1157_s12 + $0xc8] sm:$0xff] }
  0x13   : > { %v425_v13 = vadd.f32 %v1162_v2, %v389_v8  ;;  %v426_v23 = vadd.f32 %v1162_v2, %v390_v14  ;;  %v405_v32 = vmul.f32 %v1149_v1, %v369_v27  ;;  %v399_v34 = vmul.f32 %v1149_v1, %v363_v26  ;;  %v356_v40 = vld [vmem:[%s1157_s12 + $0x58] sm:$0xff]  ;;  %v349_v54 = vld [vmem:[%s1157_s12 + $0x20] sm:$0xff]  ;;  %v371_v59 = vld [vmem:[%s1157_s12 + $0xd0] sm:$0xff] }
  0x14   : > { %v449_v16 = vmax.f32 %v417_v10, 0.0  ;;  %v433_v17 = vadd.f32 %v1162_v2, %v397_v12  ;;  %v434_v25 = vadd.f32 %v1162_v2, %v398_v21  ;;  %v450_v28 = vmax.f32 %v418_v19, 0.0  ;;  %v364_v42 = vld [vmem:[%s1157_s12 + $0x98] sm:$0xff]  ;;  %v357_v56 = vld [vmem:[%s1157_s12 + $0x60] sm:$0xff]  ;;  %v350_v9 = vld [vmem:[%s1157_s12 + $0x28] sm:$0xff] }
  0x15   : > { %v457_v18 = vmax.f32 %v425_v13, 0.0  ;;  %v458_v30 = vmax.f32 %v426_v23, 0.0  ;;  %v441_v35 = vadd.f32 %v1162_v2, %v405_v32  ;;  %v419_v36 = vadd.f32 %v1162_v2, %v383_v29  ;;  %v365_v58 = vld [vmem:[%s1157_s12 + $0xa0] sm:$0xff]  ;;  %v372_v8 = vld [vmem:[%s1157_s12 + $0xd8] sm:$0xff]  ;;  %v358_v12 = vld [vmem:[%s1157_s12 + $0x68] sm:$0xff] }
  0x16   : > { %993 = vmatmul.msk.f32.vlgmr.msra.gmra.mxu0 %vm486_vm1, %v449_v16  ;;  %v465_v20 = vmax.f32 %v433_v17, 0.0  ;;  %v466_v33 = vmax.f32 %v434_v25, 0.0  ;;  %v427_v38 = vadd.f32 %v1162_v2, %v391_v31  ;;  %v435_v41 = vadd.f32 %v1162_v2, %v399_v34  ;;  %v366_v14 = vld [vmem:[%s1157_s12 + $0xa8] sm:$0xff]  ;;  %v376_v19 = vld [vmem:[%s1157_s12 + $0xf8] sm:$0xff]  ;;  %v359_v31 = vld [vmem:[%s1157_s12 + $0x70] sm:$0xff] }
  0x17   : > { %1001 = vmatmul.msk.f32.vlgmr.msra.gmra.mxu1 %vm486_vm1, %v457_v18  ;;  %v473_v39 = vmax.f32 %v441_v35, 0.0  ;;  %v451_v44 = vmax.f32 %v419_v36, 0.0  ;;  %v384_v45 = vmul.f32 %v1149_v1, %v348_v37  ;;  %v406_v46 = vmul.f32 %v1149_v1, %v370_v43  ;;  %v373_v18 = vld [vmem:[%s1157_s12 + $0xe0] sm:$0xff]  ;;  %v374_v37 = vld [vmem:[%s1157_s12 + $0xe8] sm:$0xff] }
  0x18   : > { %1009 = vmatmul.msk.f32.vlgmr.msra.gmra.mxu2 %vm486_vm1, %v465_v20  ;;  %v459_v47 = vmax.f32 %v427_v38, 0.0  ;;  %v392_v48 = vmul.f32 %v1149_v1, %v356_v40  ;;  %v467_v49 = vmax.f32 %v435_v41, 0.0  ;;  %v400_v50 = vmul.f32 %v1149_v1, %v364_v42 }
  0x19   : > { %1017 = vmatmul.msk.f32.vlgmr.msra.gmra.mxu3 %vm486_vm1, %v473_v39  ;;  %v442_v51 = vadd.f32 %v1162_v2, %v406_v46  ;;  %v420_v52 = vadd.f32 %v1162_v2, %v384_v45  ;;  %v385_v61 = vmul.f32 %v1149_v1, %v349_v54  ;;  %v407_v62 = vmul.f32 %v1149_v1, %v371_v59  ;;  %v352_v45 = vld [vmem:[%s1157_s12 + $0x38] sm:$0xff] }
  0x1a   : > { %v428_v55 = vadd.f32 %v1162_v2, %v392_v48  ;;  %v436_v57 = vadd.f32 %v1162_v2, %v400_v50  ;;  %v393_v0 = vmul.f32 %v1149_v1, %v357_v56  ;;  %v401_v4 = vmul.f32 %v1149_v1, %v365_v58 }
  0x1b   : > { %v474_v53 = vmax.f32 %v442_v51, 0.0  ;;  %v452_v60 = vmax.f32 %v420_v52, 0.0  ;;  %v443_v5 = vadd.f32 %v1162_v2, %v407_v62  ;;  %v421_v6 = vadd.f32 %v1162_v2, %v385_v61 }
  0x1c   : > { %v460_v63 = vmax.f32 %v428_v55, 0.0  ;;  %v468_v3 = vmax.f32 %v436_v57, 0.0  ;;  %v429_v10 = vadd.f32 %v1162_v2, %v393_v0  ;;  %v408_v11 = vmul.f32 %v1149_v1, %v372_v8 }
  0x1d   : > { %v475_v7 = vmax.f32 %v443_v5, 0.0  ;;  %v437_v13 = vadd.f32 %v1162_v2, %v401_v4  ;;  %v453_v16 = vmax.f32 %v421_v6, 0.0  ;;  %v386_v17 = vmul.f32 %v1149_v1, %v350_v9  ;;  %v1295_v6 = vld [vmem:[%s1515_s4] ss:$0 sm:$0xff] }
  0x1e   : > { %994 = vmatmul.msk.f32.gmra.mxu0 %vm486_vm1, %v450_v28  ;;  %v444_v15 = vadd.f32 %v1162_v2, %v408_v11  ;;  %v461_v20 = vmax.f32 %v429_v10, 0.0  ;;  %v394_v21 = vmul.f32 %v1149_v1, %v358_v12  ;;  %v402_v23 = vmul.f32 %v1149_v1, %v366_v14  ;;  %v351_v28 = vld [vmem:[%s1157_s12 + $0x30] sm:$0xff] }
  0x1f   : > { %1002 = vmatmul.msk.f32.gmra.mxu1 %vm486_vm1, %v458_v30  ;;  %v469_v22 = vmax.f32 %v437_v13, 0.0  ;;  %v409_v25 = vmul.f32 %v1149_v1, %v373_v18  ;;  %v412_v26 = vmul.f32 %v1149_v1, %v376_v19  ;;  %v422_v27 = vadd.f32 %v1162_v2, %v386_v17 }
  0x20   : > { %1010 = vmatmul.msk.f32.gmra.mxu2 %vm486_vm1, %v466_v33  ;;  %v476_v24 = vmax.f32 %v444_v15, 0.0  ;;  %v430_v29 = vadd.f32 %v1162_v2, %v394_v21  ;;  %v438_v32 = vadd.f32 %v1162_v2, %v402_v23  ;;  %v367_v33 = vld [vmem:[%s1157_s12 + $0xb0] sm:$0xff]  ;;  %v387_v36 = vmul.f32 %v1149_v1, %v351_v28 }
  0x21   : > { %1018 = vmatmul.msk.f32.gmra.mxu3 %vm486_vm1, %v474_v53  ;;  %v448_v30 = vadd.f32 %v1162_v2, %v412_v26  ;;  %v445_v34 = vadd.f32 %v1162_v2, %v409_v25  ;;  %v454_v35 = vmax.f32 %v422_v27, 0.0  ;;  %v395_v39 = vmul.f32 %v1149_v1, %v359_v31  ;;  %v375_v53 = vld [vmem:[%s1157_s12 + $0xf0] sm:$0xff] }
  0x22   : > { %v462_v38 = vmax.f32 %v430_v29, 0.0  ;;  %v470_v40 = vmax.f32 %v438_v32, 0.0  ;;  %v403_v41 = vmul.f32 %v1149_v1, %v367_v33  ;;  %v410_v43 = vmul.f32 %v1149_v1, %v374_v37 }
  0x23   : > { %v477_v42 = vmax.f32 %v445_v34, 0.0  ;;  %v431_v46 = vadd.f32 %v1162_v2, %v395_v39  ;;  %v388_v52 = vmul.f32 %v1149_v1, %v352_v45  ;;  %v411_v59 = vmul.f32 %v1149_v1, %v375_v53 }
  0x24   : > { %v439_v48 = vadd.f32 %v1162_v2, %v403_v41  ;;  %v446_v50 = vadd.f32 %v1162_v2, %v410_v43  ;;  %v480_v5 = vmax.f32 %v448_v30, 0.0 }
  0x25   : > { %v463_v54 = vmax.f32 %v431_v46, 0.0 }
  0x26   : > { %995 = vmatmul.msk.f32.gmra.mxu0 %vm486_vm1, %v451_v44  ;;  %v423_v44 = vadd.f32 %v1162_v2, %v387_v36  ;;  %v471_v56 = vmax.f32 %v439_v48, 0.0  ;;  %v478_v58 = vmax.f32 %v446_v50, 0.0 }
  0x27   : > { %1003 = vmatmul.msk.f32.gmra.mxu1 %vm486_vm1, %v459_v47  ;;  %v360_v47 = vld [vmem:[%s1157_s12 + $0x78] sm:$0xff] }
  0x28   : > { %1011 = vmatmul.msk.f32.gmra.mxu2 %vm486_vm1, %v467_v49  ;;  %v368_v49 = vld [vmem:[%s1157_s12 + $0xb8] sm:$0xff]  ;;  %v455_v51 = vmax.f32 %v423_v44, 0.0  ;;  %v396_v55 = vmul.f32 %v1149_v1, %v360_v47 }
  0x29   : > { %1019 = vmatmul.msk.f32.gmra.mxu3 %vm486_vm1, %v475_v7  ;;  %v404_v57 = vmul.f32 %v1149_v1, %v368_v49 }
  0x2a   : > { %v432_v61 = vadd.f32 %v1162_v2, %v396_v55 }
  0x2b   : > { %v440_v62 = vadd.f32 %v1162_v2, %v404_v57 }
  0x2d   : > { %v472_v1 = vmax.f32 %v440_v62, 0.0 }
  0x2e   : > { %996 = vmatmul.msk.f32.gmra.mxu0 %vm486_vm1, %v452_v60  ;;  %v424_v60 = vadd.f32 %v1162_v2, %v388_v52 }
  0x2f   : > { %1004 = vmatmul.msk.f32.gmra.mxu1 %vm486_vm1, %v460_v63  ;;  %v447_v63 = vadd.f32 %v1162_v2, %v411_v59 }
  0x30   : > { %1012 = vmatmul.msk.f32.gmra.mxu2 %vm486_vm1, %v468_v3  ;;  %v456_v0 = vmax.f32 %v424_v60, 0.0  ;;  %v464_v3 = vmax.f32 %v432_v61, 0.0 }
  0x31   : > { %1020 = vmatmul.msk.f32.gmra.mxu3 %vm486_vm1, %v476_v24  ;;  %v479_v4 = vmax.f32 %v447_v63, 0.0 }
  0x36   : > { %997 = vmatmul.msk.f32.gmra.mxu0 %vm486_vm1, %v453_v16 }
  0x37   : > { %1005 = vmatmul.msk.f32.gmra.mxu1 %vm486_vm1, %v461_v20 }
  0x38   : > { %1013 = vmatmul.msk.f32.gmra.mxu2 %vm486_vm1, %v469_v22 }
  0x39   : > { %1021 = vmatmul.msk.f32.gmra.mxu3 %vm486_vm1, %v477_v42 }
  0x3e   : > { %998 = vmatmul.msk.f32.gmra.mxu0 %vm486_vm1, %v454_v35 }
  0x3f   : > { %1006 = vmatmul.msk.f32.gmra.mxu1 %vm486_vm1, %v462_v38 }
  0x40   : > { %1014 = vmatmul.msk.f32.gmra.mxu2 %vm486_vm1, %v470_v40 }
  0x41   : > { %1022 = vmatmul.msk.f32.gmra.mxu3 %vm486_vm1, %v478_v58 }
  0x46   : > { %999 = vmatmul.msk.f32.gmra.mxu0 %vm486_vm1, %v455_v51 }
  0x47   : > { %1007 = vmatmul.msk.f32.gmra.mxu1 %vm486_vm1, %v463_v54 }
  0x48   : > { %1015 = vmatmul.msk.f32.gmra.mxu2 %vm486_vm1, %v471_v56 }
  0x49   : > { %1023 = vmatmul.msk.f32.gmra.mxu3 %vm486_vm1, %v479_v4 }
  0x4e   : > { %1000 = vmatmul.msk.f32.gmra.mxu0 %vm486_vm1, %v456_v0 }
  0x4f   : > { %1008 = vmatmul.msk.f32.gmra.mxu1 %vm486_vm1, %v464_v3 }
  0x50   : > { %1016 = vmatmul.msk.f32.gmra.mxu2 %vm486_vm1, %v472_v1 }
  0x51   : > { %1024 = vmatmul.msk.f32.gmra.mxu3 %vm486_vm1, %v480_v5 }
  0x93   : > { %v604_v2 = vpop.f32.mrf.mxu0 }
  0x94   : > { %v1305_v7 = vadd.f32 %v1295_v6, %v604_v2  ;;  %v628_v8 = vpop.f32.mrf.mxu1 }
  0x95   : > { %v1308_v9 = vadd.f32 %v1295_v6, %v628_v8 }
  0x96   : > { %700 = vst [vmem:[%s1302_s19] sm:$0xff] %v1305_v7  ;;  %v770_v49 = vmul.f32 %v1305_v7, %v1305_v7 }
  0x97   : > { %708 = vst [vmem:[%s1302_s19 + $0x40] sm:$0xff] %v1308_v9 }
  0x9b   : > { %v607_v10 = vpop.f32.mrf.mxu0  ;;  %v652_v11 = vpop.f32.mrf.mxu2 }
  0x9c   : > { %v608_v12 = vadd.f32 %v1295_v6, %v607_v10  ;;  %v631_v13 = vpop.f32.mrf.mxu1  ;;  %v1316_v14 = vadd.f32 %v1295_v6, %v652_v11  ;;  %v676_v21 = vpop.f32.mrf.mxu3 }
  0x9d   : > { %v1319_v15 = vadd.f32 %v1295_v6, %v631_v13  ;;  %v1334_v23 = vadd.f32 %v1295_v6, %v676_v21 }
  0x9e   : > { %701 = vst [vmem:[%s1302_s19 + $0x8] sm:$0xff] %v608_v12  ;;  %v771_v48 = vmul.f32 %v608_v12, %v608_v12  ;;  %v732_v50 = vadd.f32 %v608_v12, %v1305_v7 }
  0x9f   : > { %709 = vst [vmem:[%s1302_s19 + $0x48] sm:$0xff] %v1319_v15 }
  0xa0   : > { %716 = vst [vmem:[%s1302_s19 + $0x80] sm:$0xff] %v1316_v14  ;;  %v802_v52 = vadd.f32 %v771_v48, %v770_v49 }
  0xa1   : > { %724 = vst [vmem:[%s1302_s19 + $0xc0] sm:$0xff] %v1334_v23 }
  0xa3   : > { %v610_v16 = vpop.f32.mrf.mxu0  ;;  %v655_v17 = vpop.f32.mrf.mxu2 }
  0xa4   : > { %v611_v18 = vadd.f32 %v1295_v6, %v610_v16  ;;  %v634_v19 = vpop.f32.mrf.mxu1  ;;  %v1328_v20 = vadd.f32 %v1295_v6, %v655_v17  ;;  %v679_v29 = vpop.f32.mrf.mxu3 }
  0xa5   : > { %v1331_v22 = vadd.f32 %v1295_v6, %v634_v19  ;;  %v1351_v31 = vadd.f32 %v1295_v6, %v679_v29  ;;  %v778_v29 = vmul.f32 %v1308_v9, %v1308_v9 }
  0xa6   : > { %702 = vst [vmem:[%s1302_s19 + $0x10] sm:$0xff] %v611_v18  ;;  %v772_v51 = vmul.f32 %v611_v18, %v611_v18  ;;  %v733_v55 = vadd.f32 %v732_v50, %v611_v18 }
  0xa7   : > { %710 = vst [vmem:[%s1302_s19 + $0x50] sm:$0xff] %v1331_v22 }
  0xa8   : > { %717 = vst [vmem:[%s1302_s19 + $0x88] sm:$0xff] %v1328_v20  ;;  %v803_v63 = vadd.f32 %v802_v52, %v772_v51 }
  0xa9   : > { %725 = vst [vmem:[%s1302_s19 + $0xc8] sm:$0xff] %v1351_v31 }
  0xab   : > { %v613_v24 = vpop.f32.mrf.mxu0  ;;  %v658_v25 = vpop.f32.mrf.mxu2 }
  0xac   : > { %v614_v26 = vadd.f32 %v1295_v6, %v613_v24  ;;  %v637_v27 = vpop.f32.mrf.mxu1  ;;  %v1345_v28 = vadd.f32 %v1295_v6, %v658_v25  ;;  %v682_v37 = vpop.f32.mrf.mxu3 }
  0xad   : > { %v1348_v30 = vadd.f32 %v1295_v6, %v637_v27  ;;  %v1368_v39 = vadd.f32 %v1295_v6, %v682_v37 }
  0xae   : > { %703 = vst [vmem:[%s1302_s19 + $0x18] sm:$0xff] %v614_v26  ;;  %v773_v56 = vmul.f32 %v614_v26, %v614_v26  ;;  %v734_v0 = vadd.f32 %v733_v55, %v614_v26 }
  0xaf   : > { %711 = vst [vmem:[%s1302_s19 + $0x58] sm:$0xff] %v1348_v30  ;;  %v781_v49 = vmul.f32 %v1348_v30, %v1348_v30 }
  0xb0   : > { %718 = vst [vmem:[%s1302_s19 + $0x90] sm:$0xff] %v1345_v28  ;;  %v804_v1 = vadd.f32 %v803_v63, %v773_v56 }
  0xb1   : > { %726 = vst [vmem:[%s1302_s19 + $0xd0] sm:$0xff] %v1368_v39 }
  0xb3   : > { %v616_v32 = vpop.f32.mrf.mxu0  ;;  %v661_v33 = vpop.f32.mrf.mxu2 }
  0xb4   : > { %v617_v34 = vadd.f32 %v1295_v6, %v616_v32  ;;  %v640_v35 = vpop.f32.mrf.mxu1  ;;  %v1362_v36 = vadd.f32 %v1295_v6, %v661_v33  ;;  %v685_v45 = vpop.f32.mrf.mxu3 }
  0xb5   : > { %v1365_v38 = vadd.f32 %v1295_v6, %v640_v35  ;;  %v1385_v47 = vadd.f32 %v1295_v6, %v685_v45 }
  0xb6   : > { %704 = vst [vmem:[%s1302_s19 + $0x20] sm:$0xff] %v617_v34  ;;  %v774_v3 = vmul.f32 %v617_v34, %v617_v34  ;;  %v735_v4 = vadd.f32 %v734_v0, %v617_v34  ;;  %v779_v34 = vmul.f32 %v1319_v15, %v1319_v15 }
  0xb7   : > { %712 = vst [vmem:[%s1302_s19 + $0x60] sm:$0xff] %v1365_v38  ;;  %v782_v51 = vmul.f32 %v1365_v38, %v1365_v38 }
  0xb8   : > { %719 = vst [vmem:[%s1302_s19 + $0x98] sm:$0xff] %v1362_v36  ;;  %v805_v2 = vadd.f32 %v804_v1, %v774_v3 }
  0xb9   : > { %727 = vst [vmem:[%s1302_s19 + $0xd8] sm:$0xff] %v1385_v47 }
  0xbb   : > { %v619_v40 = vpop.f32.mrf.mxu0  ;;  %v664_v41 = vpop.f32.mrf.mxu2 }
  0xbc   : > { %v620_v42 = vadd.f32 %v1295_v6, %v619_v40  ;;  %v643_v43 = vpop.f32.mrf.mxu1  ;;  %v1379_v44 = vadd.f32 %v1295_v6, %v664_v41  ;;  %v688_v60 = vpop.f32.mrf.mxu3  ;;  %v780_v41 = vmul.f32 %v1331_v22, %v1331_v22 }
  0xbd   : > { %v1382_v46 = vadd.f32 %v1295_v6, %v643_v43  ;;  %v1403_v62 = vadd.f32 %v1295_v6, %v688_v60 }
  0xbe   : > { %705 = vst [vmem:[%s1302_s19 + $0x28] sm:$0xff] %v620_v42  ;;  %v775_v5 = vmul.f32 %v620_v42, %v620_v42  ;;  %v736_v7 = vadd.f32 %v735_v4, %v620_v42 }
  0xbf   : > { %713 = vst [vmem:[%s1302_s19 + $0x68] sm:$0xff] %v1382_v46 }
  0xc0   : > { %720 = vst [vmem:[%s1302_s19 + $0xa0] sm:$0xff] %v1379_v44  ;;  %v806_v12 = vadd.f32 %v805_v2, %v775_v5 }
  0xc1   : > { %728 = vst [vmem:[%s1302_s19 + $0xe0] sm:$0xff] %v1403_v62 }
  0xc3   : > { %v622_v53 = vpop.f32.mrf.mxu0  ;;  %v667_v54 = vpop.f32.mrf.mxu2 }
  0xc4   : > { %v623_v57 = vadd.f32 %v1295_v6, %v622_v53  ;;  %v646_v58 = vpop.f32.mrf.mxu1  ;;  %v1399_v59 = vadd.f32 %v1295_v6, %v667_v54  ;;  %v691_v19 = vpop.f32.mrf.mxu3  ;;  %v783_v54 = vmul.f32 %v1382_v46, %v1382_v46 }
  0xc5   : > { %v647_v61 = vadd.f32 %v1295_v6, %v646_v58  ;;  %v1417_v24 = vadd.f32 %v1295_v6, %v691_v19 }
  0xc6   : > { %706 = vst [vmem:[%s1302_s19 + $0x30] sm:$0xff] %v623_v57  ;;  %v776_v8 = vmul.f32 %v623_v57, %v623_v57  ;;  %v737_v13 = vadd.f32 %v736_v7, %v623_v57 }
  0xc7   : > { %714 = vst [vmem:[%s1302_s19 + $0x70] sm:$0xff] %v647_v61 }
  0xc8   : > { %721 = vst [vmem:[%s1302_s19 + $0xa8] sm:$0xff] %v1399_v59  ;;  %v807_v25 = vadd.f32 %v806_v12, %v776_v8  ;;  %v789_v8 = vmul.f32 %v1362_v36, %v1362_v36 }
  0xc9   : > { %729 = vst [vmem:[%s1302_s19 + $0xe8] sm:$0xff] %v1417_v24 }
  0xcb   : > { %v625_v10 = vpop.f32.mrf.mxu0  ;;  %v670_v11 = vpop.f32.mrf.mxu2 }
  0xcc   : > { %v626_v16 = vadd.f32 %v1295_v6, %v625_v10  ;;  %v649_v17 = vpop.f32.mrf.mxu1  ;;  %v1413_v18 = vadd.f32 %v1295_v6, %v670_v11  ;;  %v694_v45 = vpop.f32.mrf.mxu3 }
  0xcd   : > { %v650_v21 = vadd.f32 %v1295_v6, %v649_v17  ;;  %v1436_v48 = vadd.f32 %v1295_v6, %v694_v45 }
  0xce   : > { %707 = vst [vmem:[%s1302_s19 + $0x38] sm:$0xff] %v626_v16  ;;  %v738_v26 = vadd.f32 %v737_v13, %v626_v16  ;;  %v777_v27 = vmul.f32 %v626_v16, %v626_v16  ;;  %v791_v16 = vmul.f32 %v1399_v59, %v1399_v59 }
  0xcf   : > { %715 = vst [vmem:[%s1302_s19 + $0x78] sm:$0xff] %v650_v21  ;;  %v785_v58 = vmul.f32 %v650_v21, %v650_v21 }
  0xd0   : > { %v739_v32 = vadd.f32 %v738_v26, %v1308_v9  ;;  %v808_v33 = vadd.f32 %v807_v25, %v777_v27  ;;  %722 = vst [vmem:[%s1302_s19 + $0xb0] sm:$0xff] %v1413_v18  ;;  %v794_v27 = vmul.f32 %v1334_v23, %v1334_v23 }
  0xd1   : > { %730 = vst [vmem:[%s1302_s19 + $0xf0] sm:$0xff] %v1436_v48 }
  0xd2   : > { %v740_v35 = vadd.f32 %v739_v32, %v1319_v15  ;;  %v809_v37 = vadd.f32 %v808_v33, %v778_v29  ;;  %v795_v32 = vmul.f32 %v1351_v31, %v1351_v31 }
  0xd3   : > { %v673_v40 = vpop.f32.mrf.mxu2 }
  0xd4   : > { %v810_v42 = vadd.f32 %v809_v37, %v779_v34  ;;  %v741_v9 = vadd.f32 %v740_v35, %v1331_v22  ;;  %v674_v43 = vadd.f32 %v1295_v6, %v673_v40  ;;  %v697_v60 = vpop.f32.mrf.mxu3  ;;  %v796_v34 = vmul.f32 %v1368_v39, %v1368_v39 }
  0xd5   : > { %v698_v63 = vadd.f32 %v1295_v6, %v697_v60  ;;  %v797_v37 = vmul.f32 %v1385_v47, %v1385_v47 }
  0xd6   : > { %v742_v50 = vadd.f32 %v741_v9, %v1348_v30  ;;  %v811_v15 = vadd.f32 %v810_v42, %v780_v41  ;;  %723 = vst [vmem:[%s1302_s19 + $0xb8] sm:$0xff] %v674_v43  ;;  %v784_v30 = vmul.f32 %v647_v61, %v647_v61 }
  0xd7   : > { %731 = vst [vmem:[%s1302_s19 + $0xf8] sm:$0xff] %v698_v63 }
  0xd8   : > { %v743_v22 = vadd.f32 %v742_v50, %v1365_v38  ;;  %v812_v52 = vadd.f32 %v811_v15, %v781_v49  ;;  %v786_v38 = vmul.f32 %v1316_v14, %v1316_v14  ;;  %v801_v50 = vmul.f32 %v698_v63, %v698_v63 }
  0xda   : > { %v744_v53 = vadd.f32 %v743_v22, %v1382_v46  ;;  %v813_v55 = vadd.f32 %v812_v52, %v782_v51  ;;  %v787_v46 = vmul.f32 %v1328_v20, %v1328_v20 }
  0xdc   : > { %v814_v56 = vadd.f32 %v813_v55, %v783_v54  ;;  %v745_v57 = vadd.f32 %v744_v53, %v647_v61  ;;  %v788_v61 = vmul.f32 %v1345_v28, %v1345_v28 }
  0xde   : > { %v815_v0 = vadd.f32 %v814_v56, %v784_v30  ;;  %v746_v3 = vadd.f32 %v745_v57, %v650_v21  ;;  %v792_v21 = vmul.f32 %v1413_v18, %v1413_v18 }
  0xe0   : > { %v747_v1 = vadd.f32 %v746_v3, %v1316_v14  ;;  %v816_v4 = vadd.f32 %v815_v0, %v785_v58  ;;  %v790_v14 = vmul.f32 %v1379_v44, %v1379_v44 }
  0xe2   : > { %v748_v5 = vadd.f32 %v747_v1, %v1328_v20  ;;  %v817_v2 = vadd.f32 %v816_v4, %v786_v38 }
  0xe4   : > { %v818_v7 = vadd.f32 %v817_v2, %v787_v46  ;;  %v749_v6 = vadd.f32 %v748_v5, %v1345_v28 }
  0xe6   : > { %v750_v10 = vadd.f32 %v749_v6, %v1362_v36  ;;  %v819_v11 = vadd.f32 %v818_v7, %v788_v61  ;;  %v793_v36 = vmul.f32 %v674_v43, %v674_v43 }
  0xe8   : > { %v751_v12 = vadd.f32 %v750_v10, %v1379_v44  ;;  %v820_v13 = vadd.f32 %v819_v11, %v789_v8 }
  0xea   : > { %v752_v20 = vadd.f32 %v751_v12, %v1399_v59  ;;  %v821_v17 = vadd.f32 %v820_v13, %v790_v14 }
  0xec   : > { %v822_v19 = vadd.f32 %v821_v17, %v791_v16  ;;  %v753_v28 = vadd.f32 %v752_v20, %v1413_v18 }
  0xee   : > { %v823_v25 = vadd.f32 %v822_v19, %v792_v21  ;;  %v754_v26 = vadd.f32 %v753_v28, %v674_v43  ;;  %v799_v43 = vmul.f32 %v1417_v24, %v1417_v24 }
  0xf0   : > { %v755_v44 = vadd.f32 %v754_v26, %v1334_v23  ;;  %v824_v29 = vadd.f32 %v823_v25, %v793_v36  ;;  %v798_v23 = vmul.f32 %v1403_v62, %v1403_v62 }
  0xf2   : > { %v756_v59 = vadd.f32 %v755_v44, %v1351_v31  ;;  %v825_v33 = vadd.f32 %v824_v29, %v794_v27 }
  0xf4   : > { %v826_v35 = vadd.f32 %v825_v33, %v795_v32  ;;  %v757_v18 = vadd.f32 %v756_v59, %v1368_v39 }
  0xf6   : > { %v758_v40 = vadd.f32 %v757_v18, %v1385_v47  ;;  %v827_v41 = vadd.f32 %v826_v35, %v796_v34  ;;  %v800_v47 = vmul.f32 %v1436_v48, %v1436_v48 }
  0xf8   : > { %v759_v42 = vadd.f32 %v758_v40, %v1403_v62  ;;  %v828_v9 = vadd.f32 %v827_v41, %v797_v37 }
  0xfa   : > { %v760_v31 = vadd.f32 %v759_v42, %v1417_v24  ;;  %v829_v45 = vadd.f32 %v828_v9, %v798_v23 }
  0xfc   : > { %v830_v49 = vadd.f32 %v829_v45, %v799_v43  ;;  %v761_v39 = vadd.f32 %v760_v31, %v1436_v48 }
  0xfe   : > { %v831_v15 = vadd.f32 %v830_v49, %v800_v47  ;;  %v762_v51 = vadd.f32 %v761_v39, %v698_v63 }
 0x100   : > { %v763_v22 = vrot.slane %v762_v51, 4  ;;  %v832_v62 = vadd.f32 %v831_v15, %v801_v50 }
 0x102   : > { %v764_v52 = vadd.f32 %v763_v22, %v762_v51  ;;  %v833_v53 = vrot.slane %v832_v62, 4 }
 0x104   : > { %v765_v54 = vrot.slane %v764_v52, 2  ;;  %v834_v55 = vadd.f32 %v833_v53, %v832_v62 }
 0x106   : > { %v766_v56 = vadd.f32 %v765_v54, %v764_v52  ;;  %v835_v24 = vrot.slane %v834_v55, 2 }
 0x108   : > { %v767_v57 = vrot.slane %v766_v56, 1  ;;  %v836_v30 = vadd.f32 %v835_v24, %v834_v55 }
 0x10a   : > { %v768_v58 = vadd.f32 %v767_v57, %v766_v56  ;;  %v837_v48 = vrot.slane %v836_v30, 1 }
 0x10c   : > { %769 = vst [vmem:[%s338_s22] sm:$0x1] %v768_v58  ;;  %v838_v60 = vadd.f32 %v837_v48, %v836_v30 }
 0x10e   : > { %839 = vst [vmem:[%s343_s29] sm:$0x1] %v838_v60 }
 0x10f PF: > { %s18_s26 = sadd.s32 1, %s1081_s26   ;;  %s1519_s24 = smov %s1077_s25 }
 0x110   : > { %p15_p5 = scmp.ge.s32.totalorder %s18_s26, 4   ;;  %s1520_s25 = smov %s1522_s27 }
 0x112   :  { %17 = sbr.rel (!%p15_p5) target bundleno = 2 (0x2), region = 94 }

// kernel: pruned_bottleneck_forward.3
= control target key start
LH: loop header
LB: loop body
LE: loop exit
PB: predicated region body
PF: predicated region fallthrough
CT: control target
= control target key end

     0   :  { %s1980_s18 = smov 0   ;;  %s2767_s0 = inlined_call_operand.vmem [shape: f32[2,256,128], index: 0, kind: input, shape index: {}]   ;;  %s2768_s1 = inlined_call_operand.vmem [shape: f32[1,128], index: 1, kind: input, shape index: {}]   ;;  %s2769_s2 = inlined_call_operand.vmem [shape: f32[1,128], index: 2, kind: input, shape index: {}]   ;;  %s2770_s3 = inlined_call_operand.vmem [shape: f32[9,128,128], index: 3, kind: input, shape index: {}]   ;;  %s2771_s4 = inlined_call_operand.vmem [shape: f32[1,128], index: 4, kind: input, shape index: {}]   ;;  %s2772_s5 = inlined_call_operand.vmem [shape: f32[2,288,128], index: 5, kind: output, shape index: {}]  }
   0x1 LB: > { %s1544_s19 = sadd.s32 4294967295, %s1939_s18   ;;  %p1548_p0 = scmp.ge.s32.totalorder %s1939_s18, 1  ;;  %s1939_s18 = sphi %s1980_s18, %s15_s18  }
   0x2   : > { %p187_p1 = scmp.lt.s32.totalorder %s1939_s18, 3 }
   0x4   : > { %p188_p2 = pnand %p1548_p0, %p187_p1 }
   0x5   : > { %p215_p3 = scmp.lt.s32.totalorder (!%p188_p2), %s1544_s19, 1  ;;  %s1941_s28 = smov (!%p188_p2), 0  }
   0x6   : > { %191 = sbr.rel (%p188_p2) target bundleno = 560 (0x230), region = 40 }
   0xb   : > { %v1949_v0 = vmov 0.0   ;;  %s2774_s19 = smov (!%p215_p3, %s1544_s19), 1 }
   0xc   : > { %225 = vst [vmem:[#allocation2] sm:$0xff] %v1949_v0  ;;  %s1847_s20 = sshll.u32 %s2774_s19, 8  ;;  %s1896_s21 = smul.u32 288, %s2774_s19 }
   0xd   : > { %226 = vst [vmem:[#allocation2 + $0x8] sm:$0xff] %v1949_v0  ;;  %s1991_s24 = scalar_lea.vmem %s2767_s0, %s1847_s20 }
   0xe   : > { %227 = vst [vmem:[#allocation2 + $0x10] sm:$0xff] %v1949_v0  ;;  %s1996_s27 = scalar_lea.vmem %s2772_s5, %s1896_s21 }
   0xf   : > { %228 = vst [vmem:[#allocation2 + $0x18] sm:$0xff] %v1949_v0 }
  0x10   : > { %229 = vst [vmem:[#allocation2 + $0x20] sm:$0xff] %v1949_v0 }
  0x11   : > { %230 = vst [vmem:[#allocation2 + $0x28] sm:$0xff] %v1949_v0 }
  0x12   : > { %231 = vst [vmem:[#allocation2 + $0x30] sm:$0xff] %v1949_v0 }
  0x13   : > { %232 = vst [vmem:[#allocation2 + $0x38] sm:$0xff] %v1949_v0 }
  0x14   : > { %233 = vst [vmem:[#allocation2 + $0x40] sm:$0xff] %v1949_v0 }
  0x15   : > { %234 = vst [vmem:[#allocation2 + $0x48] sm:$0xff] %v1949_v0 }
  0x16   : > { %235 = vst [vmem:[#allocation2 + $0x50] sm:$0xff] %v1949_v0 }
  0x17   : > { %236 = vst [vmem:[#allocation2 + $0x58] sm:$0xff] %v1949_v0 }
  0x18   : > { %237 = vst [vmem:[#allocation2 + $0x60] sm:$0xff] %v1949_v0 }
  0x19   : > { %238 = vst [vmem:[#allocation2 + $0x68] sm:$0xff] %v1949_v0 }
  0x1a   : > { %239 = vst [vmem:[#allocation2 + $0x70] sm:$0xff] %v1949_v0 }
  0x1b   : > { %240 = vst [vmem:[#allocation2 + $0x78] sm:$0xff] %v1949_v0 }
  0x1c   : > { %241 = vst [vmem:[#allocation2 + $0x80] sm:$0xff] %v1949_v0 }
  0x1d   : > { %242 = vst [vmem:[#allocation2 + $0x88] sm:$0xff] %v1949_v0 }
  0x1e   : > { %243 = vst [vmem:[#allocation2 + $0x90] sm:$0xff] %v1949_v0 }
  0x1f   : > { %244 = vst [vmem:[#allocation2 + $0x98] sm:$0xff] %v1949_v0 }
  0x20   : > { %245 = vst [vmem:[#allocation2 + $0xa0] sm:$0xff] %v1949_v0 }
  0x21   : > { %246 = vst [vmem:[#allocation2 + $0xa8] sm:$0xff] %v1949_v0 }
  0x22   : > { %247 = vst [vmem:[#allocation2 + $0xb0] sm:$0xff] %v1949_v0 }
  0x23   : > { %248 = vst [vmem:[#allocation2 + $0xb8] sm:$0xff] %v1949_v0 }
  0x24   : > { %249 = vst [vmem:[#allocation2 + $0xc0] sm:$0xff] %v1949_v0 }
  0x25   : > { %250 = vst [vmem:[#allocation2 + $0xc8] sm:$0xff] %v1949_v0 }
  0x26   : > { %251 = vst [vmem:[#allocation2 + $0xd0] sm:$0xff] %v1949_v0 }
  0x27   : > { %252 = vst [vmem:[#allocation2 + $0xd8] sm:$0xff] %v1949_v0 }
  0x28   : > { %253 = vst [vmem:[#allocation2 + $0xe0] sm:$0xff] %v1949_v0 }
  0x29   : > { %254 = vst [vmem:[#allocation2 + $0xe8] sm:$0xff] %v1949_v0 }
  0x2a   : > { %255 = vst [vmem:[#allocation2 + $0xf0] sm:$0xff] %v1949_v0 }
  0x2b   : > { %256 = vst [vmem:[#allocation2 + $0xf8] sm:$0xff] %v1949_v0 }
  0x2c   : > { %257 = vst [vmem:[#allocation2 + $0x100] sm:$0xff] %v1949_v0 }
  0x2d   : > { %258 = vst [vmem:[#allocation2 + $0x108] sm:$0xff] %v1949_v0 }
  0x2e   : > { %259 = vst [vmem:[#allocation2 + $0x110] sm:$0xff] %v1949_v0 }
  0x2f   : > { %260 = vst [vmem:[#allocation2 + $0x118] sm:$0xff] %v1949_v0 }
  0x30   : > { %261 = vst [vmem:[#allocation2 + $0x120] sm:$0xff] %v1949_v0 }
  0x31   : > { %262 = vst [vmem:[#allocation2 + $0x128] sm:$0xff] %v1949_v0 }
  0x32   : > { %263 = vst [vmem:[#allocation2 + $0x130] sm:$0xff] %v1949_v0 }
  0x33   : > { %264 = vst [vmem:[#allocation2 + $0x138] sm:$0xff] %v1949_v0 }
  0x34   : > { %265 = vst [vmem:[#allocation2 + $0x140] sm:$0xff] %v1949_v0 }
  0x35   : > { %266 = vst [vmem:[#allocation2 + $0x148] sm:$0xff] %v1949_v0 }
  0x36   : > { %267 = vst [vmem:[#allocation2 + $0x150] sm:$0xff] %v1949_v0 }
  0x37   : > { %268 = vst [vmem:[#allocation2 + $0x158] sm:$0xff] %v1949_v0 }
  0x38   : > { %269 = vst [vmem:[#allocation2 + $0x160] sm:$0xff] %v1949_v0 }
  0x39 LB: >> { %v1922_v1 = vld [vmem:[%s2768_s1] ss:$0 sm:$0xff]  ;;  %s1552_s6 = sshll.u32 %s1943_s28, 4  ;;  %s1478_s10 = smul.u32 18, %s1943_s28  ;;  %s1943_s28 = sphi %s1941_s28, %s275_s28  }
  0x3a   : >> { %s277_s7 = scalar_lea.vmem %s1991_s24, %s1552_s6  ;;  %v1923_v2 = vld [vmem:[%s2769_s2] ss:$0 sm:$0xff]  ;;  %s275_s28 = sadd.s32 1, %s1943_s28  }
  0x3b   : >> { %v278_v3 = vld [vmem:[%s277_s7] sm:$0xff]  ;;  %v279_v4 = vld [vmem:[%s277_s7 + $0x8] sm:$0xff]  ;;  %s1479_s11 = scalar_lea.vmem [#allocation2], %s1478_s10  ;;  %p272_p4 = scmp.ge.s32.totalorder %s275_s28, 16  }
  0x3c   : >> { %v284_v5 = vmul.f32 %v1922_v1, %v278_v3  ;;  %v285_v6 = vmul.f32 %v1922_v1, %v279_v4  ;;  %s2005_s12 = smov (%p272_p4), 0  }
  0x3e   : >> { %v290_v7 = vadd.f32 %v1923_v2, %v284_v5  ;;  %v291_v8 = vadd.f32 %v1923_v2, %v285_v6 }
  0x3f   : > { %274 = sbr.rel (!%p272_p4) target bundleno = 57 (0x39), region = 104 }
  0x40   : >> { %v292_v9 = vmax.f32 %v290_v7, 0.0  ;;  %v293_v10 = vmax.f32 %v291_v8, 0.0 }
  0x42   : >> { %1553 = vst [vmem:[%s1479_s11 + $0x25] sm:$0xff] %v292_v9 }
  0x43   : >> { %1554 = vst [vmem:[%s1479_s11 + $0x2d] sm:$0xff] %v293_v10 }
  0x44 LB: >> { %v1606_v11 = vld [vmem:[%s2770_s3 + $0xf8] sm:$0xff]  ;;  %v1605_v12 = vld [vmem:[%s2770_s3 + $0xf0] sm:$0xff]  ;;  %v1604_v13 = vld [vmem:[%s2770_s3 + $0xe8] sm:$0xff]  ;;  %s306_s17 = smul.u32 144, %s1947_s12  ;;  %s305_s12 = sadd.s32 1, %s1947_s12   ;;  %s1947_s12 = sphi %s2005_s12, %s305_s12  }
  0x45   : >> { %1848 = vmatpush.msra.mxu1 %v1606_v11  ;;  %1849 = vmatpush.msra.mxu2 %v1606_v11  ;;  %v1603_v14 = vld [vmem:[%s2770_s3 + $0xe0] sm:$0xff]  ;;  %v1602_v15 = vld [vmem:[%s2770_s3 + $0xd8] sm:$0xff]  ;;  %v1601_v16 = vld [vmem:[%s2770_s3 + $0xd0] sm:$0xff]  ;;  %p302_p5 = scmp.ge.s32.totalorder %s305_s12, 2  }
  0x46   : >> { %381 = vmatpush.msra.mxu0 %v1606_v11  ;;  %1850 = vmatpush.msra.mxu3 %v1606_v11  ;;  %v1600_v17 = vld [vmem:[%s2770_s3 + $0xc8] sm:$0xff]  ;;  %v1599_v18 = vld [vmem:[%s2770_s3 + $0xc0] sm:$0xff]  ;;  %v1598_v19 = vld [vmem:[%s2770_s3 + $0xb8] sm:$0xff]  ;;  %s2061_s25 = scalar_lea.vmem [#allocation2], %s306_s17  ;;  %s2696_s23 = scalar_lea.vmem %s1996_s27, %s306_s17 }
  0x47   : >> { %1851 = vmatpush.msra.mxu1 %v1605_v12  ;;  %1852 = vmatpush.msra.mxu2 %v1605_v12  ;;  %v1597_v20 = vld [vmem:[%s2770_s3 + $0xb0] sm:$0xff]  ;;  %v1596_v21 = vld [vmem:[%s2770_s3 + $0xa8] sm:$0xff]  ;;  %v1595_v22 = vld [vmem:[%s2770_s3 + $0xa0] sm:$0xff] }
  0x48   : >> { %382 = vmatpush.msra.mxu0 %v1605_v12  ;;  %1853 = vmatpush.msra.mxu3 %v1605_v12  ;;  %v1594_v23 = vld [vmem:[%s2770_s3 + $0x98] sm:$0xff]  ;;  %v1593_v24 = vld [vmem:[%s2770_s3 + $0x90] sm:$0xff]  ;;  %v1592_v25 = vld [vmem:[%s2770_s3 + $0x88] sm:$0xff] }
  0x49   : >> { %1854 = vmatpush.msra.mxu1 %v1604_v13  ;;  %1855 = vmatpush.msra.mxu2 %v1604_v13  ;;  %v1591_v26 = vld [vmem:[%s2770_s3 + $0x80] sm:$0xff]  ;;  %v343_v29 = vld [vmem:[%s2770_s3 + $0x78] sm:$0xff]  ;;  %v342_v31 = vld [vmem:[%s2770_s3 + $0x70] sm:$0xff] }
  0x4a   : >> { %383 = vmatpush.msra.mxu0 %v1604_v13  ;;  %1856 = vmatpush.msra.mxu3 %v1604_v13  ;;  %v1578_v27 = vld [vmem:[%s2061_s25 + $0x3a] sm:$0xff]  ;;  %v1583_v28 = vld [vmem:[%s2061_s25 + $0x62] sm:$0xff]  ;;  %v1573_v32 = vld [vmem:[%s2061_s25 + $0x12] sm:$0xff] }
  0x4b   : >> { %1857 = vmatpush.msra.mxu1 %v1603_v14  ;;  %1858 = vmatpush.msra.mxu2 %v1603_v14  ;;  %v1640_v30 = vld [vmem:[%s2770_s3 + $0x178] sm:$0xff]  ;;  %v1587_v33 = vld [vmem:[%s2061_s25 + $0x82] sm:$0xff]  ;;  %v1639_v34 = vld [vmem:[%s2770_s3 + $0x170] sm:$0xff] }
  0x4c   : >> { %384 = vmatpush.msra.mxu0 %v1603_v14  ;;  %1859 = vmatpush.msra.mxu3 %v1603_v14  ;;  %v341_v35 = vld [vmem:[%s2770_s3 + $0x68] sm:$0xff]  ;;  %v1674_v36 = vld [vmem:[%s2770_s3 + $0x1f8] sm:$0xff]  ;;  %v340_v39 = vld [vmem:[%s2770_s3 + $0x60] sm:$0xff] }
  0x4d   : >> { %1860 = vmatpush.msra.mxu1 %v1602_v15  ;;  %1861 = vmatpush.msra.mxu2 %v1602_v15  ;;  %v1708_v37 = vld [vmem:[%s2770_s3 + $0x278] sm:$0xff]  ;;  %v1638_v38 = vld [vmem:[%s2770_s3 + $0x168] sm:$0xff]  ;;  %v1673_v40 = vld [vmem:[%s2770_s3 + $0x1f0] sm:$0xff] }
  0x4e   : >> { %385 = vmatpush.msra.mxu0 %v1602_v15  ;;  %1862 = vmatpush.msra.mxu3 %v1602_v15  ;;  %v1579_v41 = vld [vmem:[%s2061_s25 + $0x42] sm:$0xff]  ;;  %v1707_v42 = vld [vmem:[%s2770_s3 + $0x270] sm:$0xff]  ;;  %v339_v43 = vld [vmem:[%s2770_s3 + $0x58] sm:$0xff] }
  0x4f   : >> { %1863 = vmatpush.msra.mxu1 %v1601_v16  ;;  %1864 = vmatpush.msra.mxu2 %v1601_v16  ;;  %v1637_v44 = vld [vmem:[%s2770_s3 + $0x160] sm:$0xff]  ;;  %v1672_v45 = vld [vmem:[%s2770_s3 + $0x1e8] sm:$0xff]  ;;  %v338_v48 = vld [vmem:[%s2770_s3 + $0x50] sm:$0xff] }
  0x50   : >> { %386 = vmatpush.msra.mxu0 %v1601_v16  ;;  %1865 = vmatpush.msra.mxu3 %v1601_v16  ;;  %v1706_v46 = vld [vmem:[%s2770_s3 + $0x268] sm:$0xff]  ;;  %v1636_v49 = vld [vmem:[%s2770_s3 + $0x158] sm:$0xff]  ;;  %v1671_v50 = vld [vmem:[%s2770_s3 + $0x1e0] sm:$0xff] }
  0x51   : >> { %1866 = vmatpush.msra.mxu1 %v1600_v17  ;;  %1867 = vmatpush.msra.mxu2 %v1600_v17  ;;  %v1584_v47 = vld [vmem:[%s2061_s25 + $0x6a] sm:$0xff]  ;;  %v1574_v51 = vld [vmem:[%s2061_s25 + $0x1a] sm:$0xff]  ;;  %v1585_v1 = vld [vmem:[%s2061_s25 + $0x72] sm:$0xff] }
  0x52   : >> { %387 = vmatpush.msra.mxu0 %v1600_v17  ;;  %1868 = vmatpush.msra.mxu3 %v1600_v17  ;;  %v1588_v52 = vld [vmem:[%s2061_s25 + $0x8a] sm:$0xff]  ;;  %v1670_v54 = vld [vmem:[%s2770_s3 + $0x1d8] sm:$0xff]  ;;  %v1705_v55 = vld [vmem:[%s2770_s3 + $0x260] sm:$0xff] }
  0x53   : >> { %1869 = vmatpush.msra.mxu1 %v1599_v18  ;;  %1870 = vmatpush.msra.mxu2 %v1599_v18  ;;  %v1635_v53 = vld [vmem:[%s2770_s3 + $0x150] sm:$0xff]  ;;  %v337_v56 = vld [vmem:[%s2770_s3 + $0x48] sm:$0xff]  ;;  %v1704_v60 = vld [vmem:[%s2770_s3 + $0x258] sm:$0xff] }
  0x54   : >> { %388 = vmatpush.msra.mxu0 %v1599_v18  ;;  %1871 = vmatpush.msra.mxu3 %v1599_v18  ;;  %v1580_v57 = vld [vmem:[%s2061_s25 + $0x4a] sm:$0xff]  ;;  %v336_v61 = vld [vmem:[%s2770_s3 + $0x40] sm:$0xff]  ;;  %v335_v2 = vld [vmem:[%s2770_s3 + $0x38] sm:$0xff] }
  0x55   : >> { %1872 = vmatpush.msra.mxu1 %v1598_v19  ;;  %1873 = vmatpush.msra.mxu2 %v1598_v19  ;;  %v1634_v58 = vld [vmem:[%s2770_s3 + $0x148] sm:$0xff]  ;;  %v1669_v59 = vld [vmem:[%s2770_s3 + $0x1d0] sm:$0xff]  ;;  %v1633_v62 = vld [vmem:[%s2770_s3 + $0x140] sm:$0xff] }
  0x56   : >> { %389 = vmatpush.msra.mxu0 %v1598_v19  ;;  %1874 = vmatpush.msra.mxu3 %v1598_v19  ;;  %v1668_v63 = vld [vmem:[%s2770_s3 + $0x1c8] sm:$0xff]  ;;  %v1703_v0 = vld [vmem:[%s2770_s3 + $0x250] sm:$0xff]  ;;  %v1632_v3 = vld [vmem:[%s2770_s3 + $0x138] sm:$0xff] }
  0x57   : >> { %1875 = vmatpush.msra.mxu1 %v1597_v20  ;;  %1876 = vmatpush.msra.mxu2 %v1597_v20  ;;  %v1667_v4 = vld [vmem:[%s2770_s3 + $0x1c0] sm:$0xff]  ;;  %v1702_v5 = vld [vmem:[%s2770_s3 + $0x248] sm:$0xff]  ;;  %v1589_v6 = vld [vmem:[%s2061_s25 + $0x92] sm:$0xff] }
  0x58   : >> { %390 = vmatpush.msra.mxu0 %v1597_v20  ;;  %1877 = vmatpush.msra.mxu3 %v1597_v20  ;;  %v1575_v7 = vld [vmem:[%s2061_s25 + $0x22] sm:$0xff]  ;;  %v1631_v8 = vld [vmem:[%s2770_s3 + $0x130] sm:$0xff]  ;;  %v1666_v9 = vld [vmem:[%s2770_s3 + $0x1b8] sm:$0xff] }
  0x59   : >> { %1878 = vmatpush.msra.mxu1 %v1596_v21  ;;  %1879 = vmatpush.msra.mxu2 %v1596_v21  ;;  %v334_v10 = vld [vmem:[%s2770_s3 + $0x30] sm:$0xff]  ;;  %v1630_v12 = vld [vmem:[%s2770_s3 + $0x128] sm:$0xff]  ;;  %v1701_v14 = vld [vmem:[%s2770_s3 + $0x240] sm:$0xff] }
  0x5a   : >> { %391 = vmatpush.msra.mxu0 %v1596_v21  ;;  %1880 = vmatpush.msra.mxu3 %v1596_v21  ;;  %v1581_v11 = vld [vmem:[%s2061_s25 + $0x52] sm:$0xff]  ;;  %v333_v15 = vld [vmem:[%s2770_s3 + $0x28] sm:$0xff]  ;;  %v1629_v16 = vld [vmem:[%s2770_s3 + $0x120] sm:$0xff] }
  0x5b   : >> { %1881 = vmatpush.msra.mxu1 %v1595_v22  ;;  %1882 = vmatpush.msra.mxu2 %v1595_v22  ;;  %v1665_v13 = vld [vmem:[%s2770_s3 + $0x1b0] sm:$0xff]  ;;  %v1664_v17 = vld [vmem:[%s2770_s3 + $0x1a8] sm:$0xff]  ;;  %v1700_v18 = vld [vmem:[%s2770_s3 + $0x238] sm:$0xff] }
  0x5c   : >> { %392 = vmatpush.msra.mxu0 %v1595_v22  ;;  %1883 = vmatpush.msra.mxu3 %v1595_v22  ;;  %v1586_v19 = vld [vmem:[%s2061_s25 + $0x7a] sm:$0xff] }
  0x5d   : >> { %1884 = vmatpush.msra.mxu1 %v1594_v23  ;;  %1885 = vmatpush.msra.mxu2 %v1594_v23  ;;  %v332_v20 = vld [vmem:[%s2770_s3 + $0x20] sm:$0xff]  ;;  %v1628_v21 = vld [vmem:[%s2770_s3 + $0x118] sm:$0xff] }
  0x5e   : >> { %393 = vmatpush.msra.mxu0 %v1594_v23  ;;  %1886 = vmatpush.msra.mxu3 %v1594_v23  ;;  %v1663_v22 = vld [vmem:[%s2770_s3 + $0x1a0] sm:$0xff]  ;;  %v1699_v23 = vld [vmem:[%s2770_s3 + $0x230] sm:$0xff] }
  0x5f   : >> { %1887 = vmatpush.msra.mxu1 %v1593_v24  ;;  %1888 = vmatpush.msra.mxu2 %v1593_v24 }
  0x60   : >> { %394 = vmatpush.msra.mxu0 %v1593_v24  ;;  %1889 = vmatpush.msra.mxu3 %v1593_v24  ;;  %v1590_v24 = vld [vmem:[%s2061_s25 + $0x9a] sm:$0xff] }
  0x61   : >> { %1890 = vmatpush.msra.mxu1 %v1592_v25  ;;  %1891 = vmatpush.msra.mxu2 %v1592_v25 }
  0x62   : >> { %395 = vmatpush.msra.mxu0 %v1592_v25  ;;  %1892 = vmatpush.msra.mxu3 %v1592_v25  ;;  %v1576_v25 = vld [vmem:[%s2061_s25 + $0x2a] sm:$0xff] }
  0x63   : >> { %1893 = vmatpush.msra.mxu1 %v1591_v26  ;;  %1894 = vmatpush.msra.mxu2 %v1591_v26 }
  0x64   : >> { %412 = vmatmul.f32.vlgmr.msra.gmra.mxu1 %v1578_v27  ;;  %427 = vmatmul.f32.vlgmr.msra.gmra.mxu2 %v1583_v28  ;;  %v1627_v27 = vld [vmem:[%s2770_s3 + $0x110] sm:$0xff]  ;;  %v1662_v28 = vld [vmem:[%s2770_s3 + $0x198] sm:$0xff] }
  0x65   : >> { %452 = vmatpush.msrb.mxu1 %v343_v29  ;;  %560 = vmatpush.msrb.mxu2 %v1640_v30  ;;  %v1698_v29 = vld [vmem:[%s2770_s3 + $0x228] sm:$0xff]  ;;  %v1582_v30 = vld [vmem:[%s2061_s25 + $0x5a] sm:$0xff] }
  0x66   : >> { %396 = vmatpush.msra.mxu0 %v1591_v26  ;;  %1895 = vmatpush.msra.mxu3 %v1591_v26  ;;  %v331_v26 = vld [vmem:[%s2770_s3 + $0x18] sm:$0xff] }
  0x67   : >> { %453 = vmatpush.msrb.mxu1 %v342_v31  ;;  %397 = vmatmul.f32.vlgmr.msra.gmra.mxu0 %v1573_v32  ;;  %v1626_v31 = vld [vmem:[%s2770_s3 + $0x108] sm:$0xff]  ;;  %v1661_v32 = vld [vmem:[%s2770_s3 + $0x190] sm:$0xff] }
  0x68   : >> { %439 = vmatmul.f32.vlgmr.msra.gmra.mxu3 %v1587_v33  ;;  %561 = vmatpush.msrb.mxu2 %v1639_v34  ;;  %v330_v33 = vld [vmem:[%s2770_s3 + $0x10] sm:$0xff]  ;;  %v1697_v34 = vld [vmem:[%s2770_s3 + $0x220] sm:$0xff] }
  0x69   : >> { %454 = vmatpush.msrb.mxu1 %v341_v35  ;;  %686 = vmatpush.msrb.mxu3 %v1674_v36  ;;  %v1625_v35 = vld [vmem:[%s2770_s3 + $0x100] sm:$0xff]  ;;  %v1660_v36 = vld [vmem:[%s2770_s3 + $0x188] sm:$0xff] }
  0x6a   : >> { %811 = vmatpush.msrb.mxu0 %v1708_v37  ;;  %562 = vmatpush.msrb.mxu2 %v1638_v38  ;;  %v329_v37 = vld [vmem:[%s2770_s3 + $0x8] sm:$0xff]  ;;  %v1607_v38 = vld [vmem:[%s2061_s25 + $0x13] sm:$0xff] }
  0x6b   : >> { %455 = vmatpush.msrb.mxu1 %v340_v39  ;;  %687 = vmatpush.msrb.mxu3 %v1673_v40  ;;  %v1659_v39 = vld [vmem:[%s2770_s3 + $0x180] sm:$0xff]  ;;  %v1696_v40 = vld [vmem:[%s2770_s3 + $0x218] sm:$0xff] }
  0x6c   : >> { %415 = vmatmul.f32.gmra.mxu1 %v1579_v41  ;;  %812 = vmatpush.msrb.mxu0 %v1707_v42  ;;  %v1776_v41 = vld [vmem:[%s2770_s3 + $0x378] sm:$0xff] }
  0x6d   : >> { %456 = vmatpush.msrb.mxu1 %v339_v43  ;;  %563 = vmatpush.msrb.mxu2 %v1637_v44  ;;  %v1577_v42 = vld [vmem:[%s2061_s25 + $0x32] sm:$0xff]  ;;  %v328_v43 = vld [vmem:[%s2770_s3] sm:$0xff] }
  0x6e   : >> { %688 = vmatpush.msrb.mxu3 %v1672_v45  ;;  %813 = vmatpush.msrb.mxu0 %v1706_v46  ;;  %v1641_v44 = vld [vmem:[%s2061_s25 + $0x23] sm:$0xff]  ;;  %v1810_v45 = vld [vmem:[%s2770_s3 + $0x3f8] sm:$0xff]  ;;  %v1695_v46 = vld [vmem:[%s2770_s3 + $0x210] sm:$0xff] }
  0x6f   : >> { %430 = vmatmul.f32.gmra.mxu2 %v1584_v47  ;;  %457 = vmatpush.msrb.mxu1 %v338_v48  ;;  %v1555_v47 = vld [vmem:[%s2061_s25 + $0x11] sm:$0xff] }
  0x70   : >> { %564 = vmatpush.msrb.mxu2 %v1636_v49  ;;  %689 = vmatpush.msrb.mxu3 %v1671_v50  ;;  %v1775_v48 = vld [vmem:[%s2770_s3 + $0x370] sm:$0xff]  ;;  %v1742_v49 = vld [vmem:[%s2770_s3 + $0x2f8] sm:$0xff]  ;;  %v1694_v50 = vld [vmem:[%s2770_s3 + $0x208] sm:$0xff] }
  0x71   : >> { %400 = vmatmul.f32.gmra.mxu0 %v1574_v51  ;;  %442 = vmatmul.f32.gmra.mxu3 %v1588_v52  ;;  %v1809_v51 = vld [vmem:[%s2770_s3 + $0x3f0] sm:$0xff]  ;;  %v1774_v52 = vld [vmem:[%s2770_s3 + $0x368] sm:$0xff] }
  0x72   : >> { %565 = vmatpush.msrb.mxu2 %v1635_v53  ;;  %690 = vmatpush.msrb.mxu3 %v1670_v54  ;;  %v1608_v53 = vld [vmem:[%s2061_s25 + $0x1b] sm:$0xff] }
  0x73   : >> { %814 = vmatpush.msrb.mxu0 %v1705_v55  ;;  %458 = vmatpush.msrb.mxu1 %v337_v56  ;;  %v1693_v54 = vld [vmem:[%s2770_s3 + $0x200] sm:$0xff]  ;;  %v1844_v55 = vld [vmem:[%s2770_s3 + $0x478] sm:$0xff]  ;;  %v1741_v56 = vld [vmem:[%s2770_s3 + $0x2f0] sm:$0xff] }
  0x74   : >> { %418 = vmatmul.f32.gmra.mxu1 %v1580_v57  ;;  %566 = vmatpush.msrb.mxu2 %v1634_v58  ;;  %v1675_v57 = vld [vmem:[%s2061_s25 + $0x24] sm:$0xff] }
  0x75   : >> { %691 = vmatpush.msrb.mxu3 %v1669_v59  ;;  %815 = vmatpush.msrb.mxu0 %v1704_v60  ;;  %v1808_v58 = vld [vmem:[%s2770_s3 + $0x3e8] sm:$0xff]  ;;  %v1843_v60 = vld [vmem:[%s2770_s3 + $0x470] sm:$0xff] }
  0x76   : >> { %459 = vmatpush.msrb.mxu1 %v336_v61  ;;  %567 = vmatpush.msrb.mxu2 %v1633_v62  ;;  %v1642_v59 = vld [vmem:[%s2061_s25 + $0x2b] sm:$0xff]  ;;  %v1773_v62 = vld [vmem:[%s2770_s3 + $0x360] sm:$0xff] }
  0x77   : >> { %692 = vmatpush.msrb.mxu3 %v1668_v63  ;;  %816 = vmatpush.msrb.mxu0 %v1703_v0  ;;  %v1740_v61 = vld [vmem:[%s2770_s3 + $0x2e8] sm:$0xff]  ;;  %v1556_v63 = vld [vmem:[%s2061_s25 + $0x19] sm:$0xff] }
  0x78   : >> { %433 = vmatmul.f32.gmra.mxu2 %v1585_v1  ;;  %460 = vmatpush.msrb.mxu1 %v335_v2  ;;  %v1842_v0 = vld [vmem:[%s2770_s3 + $0x468] sm:$0xff]  ;;  %v1807_v1 = vld [vmem:[%s2770_s3 + $0x3e0] sm:$0xff] }
  0x79   : >> { %568 = vmatpush.msrb.mxu2 %v1632_v3  ;;  %693 = vmatpush.msrb.mxu3 %v1667_v4  ;;  %v1739_v2 = vld [vmem:[%s2770_s3 + $0x2e0] sm:$0xff]  ;;  %v1772_v3 = vld [vmem:[%s2770_s3 + $0x358] sm:$0xff] }
  0x7a   : >> { %817 = vmatpush.msrb.mxu0 %v1702_v5  ;;  %445 = vmatmul.f32.gmra.mxu3 %v1589_v6  ;;  %v1841_v4 = vld [vmem:[%s2770_s3 + $0x460] sm:$0xff]  ;;  %v1806_v5 = vld [vmem:[%s2770_s3 + $0x3d8] sm:$0xff] }
  0x7b   : >> { %403 = vmatmul.f32.gmra.mxu0 %v1575_v7  ;;  %569 = vmatpush.msrb.mxu2 %v1631_v8  ;;  %v1738_v6 = vld [vmem:[%s2770_s3 + $0x2d8] sm:$0xff]  ;;  %v1771_v7 = vld [vmem:[%s2770_s3 + $0x350] sm:$0xff] }
  0x7c   : >> { %694 = vmatpush.msrb.mxu3 %v1666_v9  ;;  %461 = vmatpush.msrb.mxu1 %v334_v10  ;;  %v1676_v8 = vld [vmem:[%s2061_s25 + $0x2c] sm:$0xff] }
  0x7d   : >> { %421 = vmatmul.f32.gmra.mxu1 %v1581_v11  ;;  %570 = vmatpush.msrb.mxu2 %v1630_v12  ;;  %v1805_v9 = vld [vmem:[%s2770_s3 + $0x3d0] sm:$0xff]  ;;  %v1840_v11 = vld [vmem:[%s2770_s3 + $0x458] sm:$0xff] }
  0x7e   : >> { %695 = vmatpush.msrb.mxu3 %v1665_v13  ;;  %818 = vmatpush.msrb.mxu0 %v1701_v14  ;;  %v1643_v10 = vld [vmem:[%s2061_s25 + $0x33] sm:$0xff]  ;;  %v1557_v13 = vld [vmem:[%s2061_s25 + $0x21] sm:$0xff] }
  0x7f   : >> { %462 = vmatpush.msrb.mxu1 %v333_v15  ;;  %571 = vmatpush.msrb.mxu2 %v1629_v16  ;;  %v1737_v12 = vld [vmem:[%s2770_s3 + $0x2d0] sm:$0xff]  ;;  %v1770_v14 = vld [vmem:[%s2770_s3 + $0x348] sm:$0xff] }
  0x80   : >> { %696 = vmatpush.msrb.mxu3 %v1664_v17  ;;  %819 = vmatpush.msrb.mxu0 %v1700_v18  ;;  %v1839_v15 = vld [vmem:[%s2770_s3 + $0x450] sm:$0xff]  ;;  %v1644_v17 = vld [vmem:[%s2061_s25 + $0x3b] sm:$0xff]  ;;  %v1804_v18 = vld [vmem:[%s2770_s3 + $0x3c8] sm:$0xff] }
  0x81   : >> { %436 = vmatmul.f32.gmra.mxu2 %v1586_v19  ;;  %463 = vmatpush.msrb.mxu1 %v332_v20  ;;  %v1677_v16 = vld [vmem:[%s2061_s25 + $0x34] sm:$0xff]  ;;  %v1558_v19 = vld [vmem:[%s2061_s25 + $0x29] sm:$0xff] }
  0x82   : >> { %572 = vmatpush.msrb.mxu2 %v1628_v21  ;;  %697 = vmatpush.msrb.mxu3 %v1663_v22  ;;  %v1736_v20 = vld [vmem:[%s2770_s3 + $0x2c8] sm:$0xff]  ;;  %v1769_v21 = vld [vmem:[%s2770_s3 + $0x340] sm:$0xff] }
  0x83   : >> { %820 = vmatpush.msrb.mxu0 %v1699_v23  ;;  %448 = vmatmul.f32.gmra.mxu3 %v1590_v24  ;;  %v1678_v22 = vld [vmem:[%s2061_s25 + $0x3c] sm:$0xff]  ;;  %v1838_v24 = vld [vmem:[%s2770_s3 + $0x448] sm:$0xff] }
  0x84   : >> { %406 = vmatmul.f32.gmra.mxu0 %v1576_v25  ;;  %464 = vmatpush.msrb.mxu1 %v331_v26  ;;  %v1645_v23 = vld [vmem:[%s2061_s25 + $0x43] sm:$0xff]  ;;  %v1559_v26 = vld [vmem:[%s2061_s25 + $0x31] sm:$0xff] }
  0x85   : >> { %573 = vmatpush.msrb.mxu2 %v1627_v27  ;;  %698 = vmatpush.msrb.mxu3 %v1662_v28  ;;  %v1803_v25 = vld [vmem:[%s2770_s3 + $0x3c0] sm:$0xff] }
  0x86   : >> { %821 = vmatpush.msrb.mxu0 %v1698_v29  ;;  %424 = vmatmul.f32.gmra.mxu1 %v1582_v30  ;;  %v1735_v27 = vld [vmem:[%s2770_s3 + $0x2c0] sm:$0xff]  ;;  %v1646_v29 = vld [vmem:[%s2061_s25 + $0x4b] sm:$0xff]  ;;  %v1768_v30 = vld [vmem:[%s2770_s3 + $0x338] sm:$0xff] }
  0x87   : >> { %574 = vmatpush.msrb.mxu2 %v1626_v31  ;;  %699 = vmatpush.msrb.mxu3 %v1661_v32  ;;  %v1679_v28 = vld [vmem:[%s2061_s25 + $0x44] sm:$0xff]  ;;  %v1560_v32 = vld [vmem:[%s2061_s25 + $0x39] sm:$0xff] }
  0x88   : >> { %465 = vmatpush.msrb.mxu1 %v330_v33  ;;  %822 = vmatpush.msrb.mxu0 %v1697_v34  ;;  %v1837_v31 = vld [vmem:[%s2770_s3 + $0x440] sm:$0xff]  ;;  %v1802_v33 = vld [vmem:[%s2770_s3 + $0x3b8] sm:$0xff] }
  0x89   : >> { %575 = vmatpush.msrb.mxu2 %v1625_v35  ;;  %700 = vmatpush.msrb.mxu3 %v1660_v36  ;;  %v1734_v34 = vld [vmem:[%s2770_s3 + $0x2b8] sm:$0xff]  ;;  %v1680_v35 = vld [vmem:[%s2061_s25 + $0x4c] sm:$0xff] }
  0x8a   : >> { %466 = vmatpush.msrb.mxu1 %v329_v37  ;;  %576 = vmatmul.f32.vlgmr.msrb.gmra.mxu2 %v1607_v38  ;;  %v1647_v36 = vld [vmem:[%s2061_s25 + $0x53] sm:$0xff]  ;;  %v1561_v38 = vld [vmem:[%s2061_s25 + $0x41] sm:$0xff] }
  0x8b   : >> { %701 = vmatpush.msrb.mxu3 %v1659_v39  ;;  %823 = vmatpush.msrb.mxu0 %v1696_v40  ;;  %v1767_v37 = vld [vmem:[%s2770_s3 + $0x330] sm:$0xff]  ;;  %v1836_v39 = vld [vmem:[%s2770_s3 + $0x438] sm:$0xff] }
  0x8c   : >> { %1063 = vmatpush.msra.mxu2 %v1776_v41  ;;  %409 = vmatmul.f32.gmra.mxu0 %v1577_v42  ;;  %v1801_v40 = vld [vmem:[%s2770_s3 + $0x3b0] sm:$0xff] }
  0x8d   : >> { %467 = vmatpush.msrb.mxu1 %v328_v43  ;;  %702 = vmatmul.f32.vlgmr.msrb.gmra.mxu3 %v1641_v44  ;;  %v1733_v41 = vld [vmem:[%s2770_s3 + $0x2b0] sm:$0xff]  ;;  %v1648_v43 = vld [vmem:[%s2061_s25 + $0x5b] sm:$0xff] }
  0x8e   : >> { %1189 = vmatpush.msra.mxu3 %v1810_v45  ;;  %824 = vmatpush.msrb.mxu0 %v1695_v46  ;;  %v1681_v42 = vld [vmem:[%s2061_s25 + $0x54] sm:$0xff]  ;;  %v1766_v45 = vld [vmem:[%s2770_s3 + $0x328] sm:$0xff] }
  0x8f   : >> { %468 = vmatmul.f32.vlgmr.msrb.gmra.mxu1 %v1555_v47  ;;  %1064 = vmatpush.msra.mxu2 %v1775_v48  ;;  %v1835_v46 = vld [vmem:[%s2770_s3 + $0x430] sm:$0xff]  ;;  %v1800_v47 = vld [vmem:[%s2770_s3 + $0x3a8] sm:$0xff] }
  0x90   : >> { %937 = vmatpush.msra.mxu1 %v1742_v49  ;;  %825 = vmatpush.msrb.mxu0 %v1694_v50  ;;  %v1732_v48 = vld [vmem:[%s2770_s3 + $0x2a8] sm:$0xff]  ;;  %v1682_v49 = vld [vmem:[%s2061_s25 + $0x5c] sm:$0xff] }
  0x91   : >> { %1190 = vmatpush.msra.mxu3 %v1809_v51  ;;  %1065 = vmatpush.msra.mxu2 %v1774_v52  ;;  %v1649_v50 = vld [vmem:[%s2061_s25 + $0x63] sm:$0xff]  ;;  %v1563_v51 = vld [vmem:[%s2061_s25 + $0x51] sm:$0xff] }
  0x92   : >> { %579 = vmatmul.f32.gmra.mxu2 %v1608_v53  ;;  %826 = vmatpush.msrb.mxu0 %v1693_v54  ;;  %v1765_v52 = vld [vmem:[%s2770_s3 + $0x320] sm:$0xff]  ;;  %v1834_v53 = vld [vmem:[%s2770_s3 + $0x428] sm:$0xff] }
  0x93   : >> { %938 = vmatpush.msra.mxu1 %v1741_v56  ;;  %1191 = vmatpush.msra.mxu3 %v1808_v58  ;;  %v1799_v54 = vld [vmem:[%s2770_s3 + $0x3a0] sm:$0xff] }
  0x94   : >> { %1315 = vmatpush.msra.mxu0 %v1844_v55  ;;  %1066 = vmatpush.msra.mxu2 %v1773_v62  ;;  %v1731_v55 = vld [vmem:[%s2770_s3 + $0x2a0] sm:$0xff]  ;;  %v1684_v62 = vld [vmem:[%s2061_s25 + $0x6c] sm:$0xff] }
  0x95   : >> { %827 = vmatmul.f32.vlgmr.msrb.gmra.mxu0 %v1675_v57  ;;  %705 = vmatmul.f32.gmra.mxu3 %v1642_v59  ;;  %v1683_v56 = vld [vmem:[%s2061_s25 + $0x64] sm:$0xff]  ;;  %v1564_v58 = vld [vmem:[%s2061_s25 + $0x59] sm:$0xff] }
  0x96   : >> { %1316 = vmatpush.msra.mxu0 %v1843_v60  ;;  %939 = vmatpush.msra.mxu1 %v1740_v61  ;;  %v1650_v57 = vld [vmem:[%s2061_s25 + $0x6b] sm:$0xff]  ;;  %v1833_v60 = vld [vmem:[%s2770_s3 + $0x420] sm:$0xff]  ;;  %v1798_v61 = vld [vmem:[%s2770_s3 + $0x398] sm:$0xff] }
  0x97   : >> { %471 = vmatmul.f32.gmra.mxu1 %v1556_v63  ;;  %1192 = vmatpush.msra.mxu3 %v1807_v1  ;;  %v1651_v63 = vld [vmem:[%s2061_s25 + $0x73] sm:$0xff]  ;;  %v1565_v1 = vld [vmem:[%s2061_s25 + $0x61] sm:$0xff] }
  0x98   : >> { %1317 = vmatpush.msra.mxu0 %v1842_v0  ;;  %940 = vmatpush.msra.mxu1 %v1739_v2  ;;  %v1730_v0 = vld [vmem:[%s2770_s3 + $0x298] sm:$0xff]  ;;  %v1763_v2 = vld [vmem:[%s2770_s3 + $0x310] sm:$0xff] }
  0x99   : >> { %1067 = vmatpush.msra.mxu2 %v1772_v3  ;;  %1193 = vmatpush.msra.mxu3 %v1806_v5  ;;  %v1832_v3 = vld [vmem:[%s2770_s3 + $0x418] sm:$0xff] }
  0x9a   : >> { %1318 = vmatpush.msra.mxu0 %v1841_v4  ;;  %582 = vmatmul.f32.gmra.mxu2 %v1641_v44  ;;  %v1562_v44 = vld [vmem:[%s2061_s25 + $0x49] sm:$0xff]  ;;  %v1685_v5 = vld [vmem:[%s2061_s25 + $0x74] sm:$0xff] }
  0x9b   : >> { %941 = vmatpush.msra.mxu1 %v1738_v6  ;;  %1068 = vmatpush.msra.mxu2 %v1771_v7  ;;  %v1797_v6 = vld [vmem:[%s2770_s3 + $0x390] sm:$0xff]  ;;  %v1652_v7 = vld [vmem:[%s2061_s25 + $0x7b] sm:$0xff] }
  0x9c   : >> { %1194 = vmatpush.msra.mxu3 %v1805_v9  ;;  %1319 = vmatpush.msra.mxu0 %v1840_v11  ;;  %v1566_v9 = vld [vmem:[%s2061_s25 + $0x69] sm:$0xff] }
  0x9d   : >> { %830 = vmatmul.f32.gmra.mxu0 %v1676_v8  ;;  %708 = vmatmul.f32.gmra.mxu3 %v1643_v10  ;;  %v1729_v8 = vld [vmem:[%s2770_s3 + $0x290] sm:$0xff]  ;;  %v1762_v11 = vld [vmem:[%s2770_s3 + $0x308] sm:$0xff] }
  0x9e   : >> { %942 = vmatpush.msra.mxu1 %v1737_v12  ;;  %1069 = vmatpush.msra.mxu2 %v1770_v14  ;;  %v1686_v14 = vld [vmem:[%s2061_s25 + $0x7c] sm:$0xff] }
  0x9f   : >> { %474 = vmatmul.f32.gmra.mxu1 %v1557_v13  ;;  %1320 = vmatpush.msra.mxu0 %v1839_v15  ;;  %v1831_v15 = vld [vmem:[%s2770_s3 + $0x410] sm:$0xff] }
  0xa0   : >> { %1195 = vmatpush.msra.mxu3 %v1804_v18  ;;  %943 = vmatpush.msra.mxu1 %v1736_v20  ;;  %v1728_v20 = vld [vmem:[%s2770_s3 + $0x288] sm:$0xff] }
  0xa1   : >> { %1070 = vmatpush.msra.mxu2 %v1769_v21  ;;  %1321 = vmatpush.msra.mxu0 %v1838_v24  ;;  %v1654_v24 = vld [vmem:[%s2061_s25 + $0x8b] sm:$0xff] }
  0xa2   : >> { %585 = vmatmul.f32.gmra.mxu2 %v1642_v59  ;;  %1196 = vmatpush.msra.mxu3 %v1803_v25  ;;  %v1764_v59 = vld [vmem:[%s2770_s3 + $0x318] sm:$0xff] }
  0xa3   : >> { %944 = vmatpush.msra.mxu1 %v1735_v27  ;;  %1071 = vmatpush.msra.mxu2 %v1768_v30  ;;  %v1830_v27 = vld [vmem:[%s2770_s3 + $0x408] sm:$0xff]  ;;  %v1795_v30 = vld [vmem:[%s2770_s3 + $0x380] sm:$0xff] }
  0xa4   : >> { %1322 = vmatpush.msra.mxu0 %v1837_v31  ;;  %1197 = vmatpush.msra.mxu3 %v1802_v33  ;;  %v1727_v31 = vld [vmem:[%s2770_s3 + $0x280] sm:$0xff]  ;;  %v1688_v33 = vld [vmem:[%s2061_s25 + $0x8c] sm:$0xff] }
  0xa5   : >> { %833 = vmatmul.f32.gmra.mxu0 %v1677_v16  ;;  %711 = vmatmul.f32.gmra.mxu3 %v1644_v17  ;;  %v1653_v16 = vld [vmem:[%s2061_s25 + $0x83] sm:$0xff] }
  0xa6   : >> { %945 = vmatpush.msra.mxu1 %v1734_v34  ;;  %1072 = vmatpush.msra.mxu2 %v1767_v37  ;;  %v1569_v37 = vld [vmem:[%s2061_s25 + $0x81] sm:$0xff] }
  0xa7   : >> { %477 = vmatmul.f32.gmra.mxu1 %v1558_v19  ;;  %1323 = vmatpush.msra.mxu0 %v1836_v39  ;;  %v1567_v19 = vld [vmem:[%s2061_s25 + $0x71] sm:$0xff]  ;;  %v1829_v39 = vld [vmem:[%s2770_s3 + $0x400] sm:$0xff] }
  0xa8   : >> { %1198 = vmatpush.msra.mxu3 %v1801_v40  ;;  %946 = vmatpush.msra.mxu1 %v1733_v41  ;;  %v1689_v41 = vld [vmem:[%s2061_s25 + $0x94] sm:$0xff] }
  0xa9   : >> { %1073 = vmatpush.msra.mxu2 %v1766_v45  ;;  %1324 = vmatpush.msra.mxu0 %v1835_v46  ;;  %v1570_v45 = vld [vmem:[%s2061_s25 + $0x89] sm:$0xff] }
  0xaa   : >> { %588 = vmatmul.f32.gmra.mxu2 %v1643_v10  ;;  %1199 = vmatpush.msra.mxu3 %v1800_v47 }
  0xab   : >> { %947 = vmatpush.msra.mxu1 %v1732_v48  ;;  %1074 = vmatpush.msra.mxu2 %v1765_v52  ;;  %v1690_v48 = vld [vmem:[%s2061_s25 + $0x9c] sm:$0xff] }
  0xac   : >> { %1325 = vmatpush.msra.mxu0 %v1834_v53  ;;  %1200 = vmatpush.msra.mxu3 %v1799_v54 }
  0xad   : >> { %836 = vmatmul.f32.gmra.mxu0 %v1678_v22  ;;  %714 = vmatmul.f32.gmra.mxu3 %v1645_v23 }
  0xae   : >> { %948 = vmatpush.msra.mxu1 %v1731_v55  ;;  %1075 = vmatpush.msra.mxu2 %v1764_v59  ;;  %v1658_v59 = vld [vmem:[%s2061_s25 + $0xab] sm:$0xff] }
  0xaf   : >> { %480 = vmatmul.f32.gmra.mxu1 %v1559_v26  ;;  %1326 = vmatpush.msra.mxu0 %v1833_v60  ;;  %v1761_v26 = vld [vmem:[%s2770_s3 + $0x300] sm:$0xff] }
  0xb0   : >> { %1201 = vmatpush.msra.mxu3 %v1798_v61  ;;  %949 = vmatpush.msra.mxu1 %v1730_v0  ;;  %v1572_v61 = vld [vmem:[%s2061_s25 + $0x99] sm:$0xff] }
  0xb1   : >> { %1076 = vmatpush.msra.mxu2 %v1763_v2  ;;  %1327 = vmatpush.msra.mxu0 %v1832_v3 }
  0xb2   : >> { %591 = vmatmul.f32.gmra.mxu2 %v1644_v17  ;;  %1202 = vmatpush.msra.mxu3 %v1797_v6  ;;  %v1796_v17 = vld [vmem:[%s2770_s3 + $0x388] sm:$0xff] }
  0xb3   : >> { %950 = vmatpush.msra.mxu1 %v1729_v8  ;;  %1077 = vmatpush.msra.mxu2 %v1762_v11  ;;  %v1692_v6 = vld [vmem:[%s2061_s25 + $0xac] sm:$0xff] }
  0xb4   : >> { %1328 = vmatpush.msra.mxu0 %v1831_v15  ;;  %1203 = vmatpush.msra.mxu3 %v1796_v17  ;;  %v1744_v15 = vld [vmem:[%s2061_s25 + $0x3d] sm:$0xff] }
  0xb5   : >> { %839 = vmatmul.f32.gmra.mxu0 %v1679_v28  ;;  %717 = vmatmul.f32.gmra.mxu3 %v1646_v29  ;;  %v1568_v28 = vld [vmem:[%s2061_s25 + $0x79] sm:$0xff] }
  0xb6   : >> { %951 = vmatpush.msra.mxu1 %v1728_v20  ;;  %1078 = vmatpush.msra.mxu2 %v1761_v26  ;;  %v1811_v20 = vld [vmem:[%s2061_s25 + $0x37] sm:$0xff] }
  0xb7   : >> { %483 = vmatmul.f32.gmra.mxu1 %v1560_v32  ;;  %1329 = vmatpush.msra.mxu0 %v1830_v27 }
  0xb8   : >> { %1204 = vmatpush.msra.mxu3 %v1795_v30  ;;  %952 = vmatpush.msra.mxu1 %v1727_v31  ;;  %v1745_v30 = vld [vmem:[%s2061_s25 + $0x45] sm:$0xff] }
  0xb9   : >> { %1330 = vmatpush.msra.mxu0 %v1829_v39 }
  0xba   : >> { %594 = vmatmul.f32.gmra.mxu2 %v1645_v23  ;;  %v1687_v23 = vld [vmem:[%s2061_s25 + $0x84] sm:$0xff] }
  0xbd   : >> { %842 = vmatmul.f32.gmra.mxu0 %v1680_v35  ;;  %720 = vmatmul.f32.gmra.mxu3 %v1647_v36  ;;  %v1655_v35 = vld [vmem:[%s2061_s25 + $0x93] sm:$0xff] }
  0xbf   : >> { %486 = vmatmul.f32.gmra.mxu1 %v1561_v38 }
  0xc2   : >> { %597 = vmatmul.f32.gmra.mxu2 %v1646_v29 }
  0xc5   : >> { %845 = vmatmul.f32.gmra.mxu0 %v1681_v42  ;;  %723 = vmatmul.f32.gmra.mxu3 %v1648_v43  ;;  %v1656_v42 = vld [vmem:[%s2061_s25 + $0x9b] sm:$0xff] }
  0xc7   : >> { %489 = vmatmul.f32.gmra.mxu1 %v1562_v44 }
  0xca   : >> { %600 = vmatmul.f32.gmra.mxu2 %v1647_v36 }
  0xcd   : >> { %848 = vmatmul.f32.gmra.mxu0 %v1682_v49  ;;  %726 = vmatmul.f32.gmra.mxu3 %v1649_v50  ;;  %v1657_v49 = vld [vmem:[%s2061_s25 + $0xa3] sm:$0xff] }
  0xcf   : >> { %492 = vmatmul.f32.gmra.mxu1 %v1563_v51  ;;  %v1571_v51 = vld [vmem:[%s2061_s25 + $0x91] sm:$0xff] }
  0xd2   : >> { %603 = vmatmul.f32.gmra.mxu2 %v1648_v43 }
  0xd5   : >> { %851 = vmatmul.f32.gmra.mxu0 %v1683_v56  ;;  %729 = vmatmul.f32.gmra.mxu3 %v1650_v57 }
  0xd7   : >> { %495 = vmatmul.f32.gmra.mxu1 %v1564_v58  ;;  %v1691_v58 = vld [vmem:[%s2061_s25 + $0xa4] sm:$0xff] }
  0xda   : >> { %606 = vmatmul.f32.gmra.mxu2 %v1649_v50 }
  0xdd   : >> { %854 = vmatmul.f32.gmra.mxu0 %v1684_v62  ;;  %732 = vmatmul.f32.gmra.mxu3 %v1651_v63 }
  0xdf   : >> { %498 = vmatmul.f32.gmra.mxu1 %v1565_v1  ;;  %v1743_v1 = vld [vmem:[%s2061_s25 + $0x35] sm:$0xff] }
  0xe1   : >> { %v2466_v4 = vpop.f32.mrf.mxu1 }
  0xe2   : >> { %609 = vmatmul.f32.gmra.mxu2 %v1650_v57 }
  0xe4   : >> { %v2477_v10 = vpop.f32.mrf.mxu0 }
  0xe5   : >> { %857 = vmatmul.f32.gmra.mxu0 %v1685_v5  ;;  %735 = vmatmul.f32.gmra.mxu3 %v1652_v7 }
  0xe7   : >> { %501 = vmatmul.f32.gmra.mxu1 %v1566_v9  ;;  %v2482_v12 = vpop.f32.mrf.mxu2  ;;  %v1709_v9 = vld [vmem:[%s2061_s25 + $0x25] sm:$0xff] }
  0xe9   : >> { %v2484_v13 = vpop.f32.mrf.mxu1 }
  0xea   : >> { %612 = vmatmul.f32.gmra.mxu2 %v1651_v63 }
  0xeb   : >> { %v2494_v18 = vpop.f32.mrf.mxu3 }
  0xed   : >> { %860 = vmatmul.f32.gmra.mxu0 %v1686_v14  ;;  %738 = vmatmul.f32.gmra.mxu3 %v1653_v16 }
  0xee   : >> { %v2500_v21 = vpop.f32.mrf.mxu0 }
  0xef   : >> { %504 = vmatmul.f32.gmra.mxu1 %v1567_v19 }
  0xf1   : >> { %v2502_v22 = vpop.f32.mrf.mxu1 }
  0xf2   : >> { %615 = vmatmul.f32.gmra.mxu2 %v1652_v7  ;;  %v2506_v25 = vpop.f32.mrf.mxu2  ;;  %v1777_v7 = vld [vmem:[%s2061_s25 + $0x36] sm:$0xff] }
  0xf4   : >> { %v2515_v29 = vpop.f32.mrf.mxu3 }
  0xf5   : >> { %863 = vmatmul.f32.gmra.mxu0 %v1687_v23  ;;  %741 = vmatmul.f32.gmra.mxu3 %v1654_v24 }
  0xf7   : >> { %507 = vmatmul.f32.gmra.mxu1 %v1568_v28 }
  0xf8   : >> { %v404_v32 = vpop.f32.mrf.mxu0 }
  0xfa   : >> { %618 = vmatmul.f32.gmra.mxu2 %v1653_v16  ;;  %v2524_v34 = vpop.f32.mrf.mxu1 }
  0xfb   : >> { %v2527_v36 = vpop.f32.mrf.mxu2 }
  0xfd   : >> { %866 = vmatmul.f32.gmra.mxu0 %v1688_v33  ;;  %744 = vmatmul.f32.gmra.mxu3 %v1655_v35  ;;  %v2530_v38 = vpop.f32.mrf.mxu3 }
  0xff   : >> { %510 = vmatmul.f32.gmra.mxu1 %v1569_v37  ;;  %v1779_v37 = vld [vmem:[%s2061_s25 + $0x46] sm:$0xff] }
 0x101   : >> { %v407_v40 = vpop.f32.mrf.mxu0 }
 0x102   : >> { %621 = vmatmul.f32.gmra.mxu2 %v1654_v24  ;;  %v1710_v24 = vld [vmem:[%s2061_s25 + $0x2d] sm:$0xff] }
 0x103   : >> { %v2537_v43 = vpop.f32.mrf.mxu1 }
 0x104   : >> { %v2539_v44 = vpop.f32.mrf.mxu2 }
 0x105   : >> { %869 = vmatmul.f32.gmra.mxu0 %v1689_v41  ;;  %747 = vmatmul.f32.gmra.mxu3 %v1656_v42 }
 0x106   : >> { %v2542_v46 = vpop.f32.mrf.mxu3 }
 0x107   : >> { %513 = vmatmul.f32.gmra.mxu1 %v1570_v45  ;;  %v1746_v45 = vld [vmem:[%s2061_s25 + $0x4d] sm:$0xff] }
 0x109   : >> { %v2544_v47 = vpop.f32.mrf.mxu0 }
 0x10a   : >> { %624 = vmatmul.f32.gmra.mxu2 %v1655_v35  ;;  %v1812_v35 = vld [vmem:[%s2061_s25 + $0x3f] sm:$0xff] }
 0x10c   : >> { %v469_v50 = vpop.f32.mrf.mxu1 }
 0x10d   : >> { %872 = vmatmul.f32.gmra.mxu0 %v1690_v48  ;;  %v470_v52 = vadd.f32 %v469_v50, %v2477_v10  ;;  %750 = vmatmul.f32.gmra.mxu3 %v1657_v49  ;;  %v577_v53 = vpop.f32.mrf.mxu2 }
 0x10f   : >> { %v631_v54 = vadd.f32 %v577_v53, %v470_v52  ;;  %516 = vmatmul.f32.gmra.mxu1 %v1571_v51  ;;  %v1813_v51 = vld [vmem:[%s2061_s25 + $0x47] sm:$0xff] }
 0x110   : >> { %v703_v55 = vpop.f32.mrf.mxu3  ;;  %v1780_v52 = vld [vmem:[%s2061_s25 + $0x4e] sm:$0xff] }
 0x111   : >> { %v2550_v56 = vadd.f32 %v703_v55, %v631_v54 }
 0x112   : >> { %v2552_v57 = vpop.f32.mrf.mxu0  ;;  %627 = vmatmul.f32.gmra.mxu2 %v1656_v42 }
 0x114   : >> { %v472_v60 = vpop.f32.mrf.mxu1 }
 0x115   : >> { %875 = vmatmul.f32.gmra.mxu0 %v1691_v58  ;;  %v473_v62 = vadd.f32 %v472_v60, %v2500_v21  ;;  %753 = vmatmul.f32.gmra.mxu3 %v1658_v59  ;;  %v580_v63 = vpop.f32.mrf.mxu2  ;;  %v1778_v21 = vld [vmem:[%s2061_s25 + $0x3e] sm:$0xff]  ;;  %v1747_v58 = vld [vmem:[%s2061_s25 + $0x55] sm:$0xff] }
 0x117   : >> { %v632_v0 = vadd.f32 %v580_v63, %v473_v62  ;;  %519 = vmatmul.f32.gmra.mxu1 %v1572_v61  ;;  %v1814_v62 = vld [vmem:[%s2061_s25 + $0x4f] sm:$0xff] }
 0x118   : >> { %v706_v2 = vpop.f32.mrf.mxu3  ;;  %v1781_v63 = vld [vmem:[%s2061_s25 + $0x56] sm:$0xff] }
 0x119   : >> { %v2559_v3 = vadd.f32 %v706_v2, %v632_v0 }
 0x11a   : >> { %v2561_v5 = vpop.f32.mrf.mxu0  ;;  %1079 = vmatmul.f32.vlgmr.msra.gmra.mxu2 %v1743_v1 }
 0x11c   : >> { %v475_v8 = vpop.f32.mrf.mxu1 }
 0x11d   : >> { %878 = vmatmul.f32.gmra.mxu0 %v1692_v6  ;;  %v476_v10 = vadd.f32 %v475_v8, %v404_v32  ;;  %1205 = vmatmul.f32.vlgmr.msra.gmra.mxu3 %v1777_v7  ;;  %v583_v11 = vpop.f32.mrf.mxu2  ;;  %v1748_v6 = vld [vmem:[%s2061_s25 + $0x5d] sm:$0xff] }
 0x11f   : >> { %v633_v14 = vadd.f32 %v583_v11, %v476_v10  ;;  %953 = vmatmul.f32.vlgmr.msra.gmra.mxu1 %v1709_v9  ;;  %v1815_v10 = vld [vmem:[%s2061_s25 + $0x57] sm:$0xff] }
 0x120   : >> { %v709_v16 = vpop.f32.mrf.mxu3  ;;  %v1782_v11 = vld [vmem:[%s2061_s25 + $0x5e] sm:$0xff] }
 0x121   : >> { %v2567_v17 = vadd.f32 %v709_v16, %v633_v14 }
 0x122   : >> { %v2569_v19 = vpop.f32.mrf.mxu0  ;;  %1082 = vmatmul.f32.gmra.mxu2 %v1744_v15 }
 0x124   : >> { %v478_v23 = vpop.f32.mrf.mxu1 }
 0x125   : >> { %1331 = vmatmul.f32.vlgmr.msra.gmra.mxu0 %v1811_v20  ;;  %v479_v26 = vadd.f32 %v478_v23, %v407_v40  ;;  %1208 = vmatmul.f32.gmra.mxu3 %v1778_v21  ;;  %v586_v27 = vpop.f32.mrf.mxu2  ;;  %v1749_v20 = vld [vmem:[%s2061_s25 + $0x65] sm:$0xff] }
 0x127   : >> { %v634_v28 = vadd.f32 %v586_v27, %v479_v26  ;;  %956 = vmatmul.f32.gmra.mxu1 %v1710_v24  ;;  %v1816_v26 = vld [vmem:[%s2061_s25 + $0x5f] sm:$0xff] }
 0x128   : >> { %v712_v31 = vpop.f32.mrf.mxu3  ;;  %v1783_v27 = vld [vmem:[%s2061_s25 + $0x66] sm:$0xff] }
 0x129   : >> { %v2575_v32 = vadd.f32 %v712_v31, %v634_v28 }
 0x12a   : >> { %v2577_v33 = vpop.f32.mrf.mxu0  ;;  %1085 = vmatmul.f32.gmra.mxu2 %v1745_v30 }
 0x12c   : >> { %v481_v39 = vpop.f32.mrf.mxu1 }
 0x12d   : >> { %1334 = vmatmul.f32.gmra.mxu0 %v1812_v35  ;;  %v482_v40 = vadd.f32 %v481_v39, %v2544_v47  ;;  %1211 = vmatmul.f32.gmra.mxu3 %v1779_v37  ;;  %v589_v41 = vpop.f32.mrf.mxu2  ;;  %v1750_v35 = vld [vmem:[%s2061_s25 + $0x6d] sm:$0xff] }
 0x12f   : >> { %v635_v42 = vadd.f32 %v589_v41, %v482_v40  ;;  %959 = vmatmul.f32.gmra.mxu1 %v1743_v1  ;;  %v1817_v41 = vld [vmem:[%s2061_s25 + $0x67] sm:$0xff] }
 0x130   : >> { %v715_v48 = vpop.f32.mrf.mxu3 }
 0x131   : >> { %v2583_v49 = vadd.f32 %v715_v48, %v635_v42  ;;  %v1784_v42 = vld [vmem:[%s2061_s25 + $0x6e] sm:$0xff] }
 0x132   : >> { %v2585_v50 = vpop.f32.mrf.mxu0  ;;  %1088 = vmatmul.f32.gmra.mxu2 %v1746_v45 }
 0x134   : >> { %v484_v53 = vpop.f32.mrf.mxu1 }
 0x135   : >> { %1337 = vmatmul.f32.gmra.mxu0 %v1813_v51  ;;  %v485_v47 = vadd.f32 %v484_v53, %v2466_v4  ;;  %1214 = vmatmul.f32.gmra.mxu3 %v1780_v52  ;;  %v592_v54 = vpop.f32.mrf.mxu2  ;;  %v1751_v52 = vld [vmem:[%s2061_s25 + $0x75] sm:$0xff] }
 0x137   : >> { %v636_v55 = vadd.f32 %v592_v54, %v485_v47  ;;  %962 = vmatmul.f32.gmra.mxu1 %v1744_v15 }
 0x138   : >> { %v718_v59 = vpop.f32.mrf.mxu3 }
 0x139   : >> { %v2591_v60 = vadd.f32 %v718_v59, %v636_v55  ;;  %v1818_v55 = vld [vmem:[%s2061_s25 + $0x6f] sm:$0xff] }
 0x13a   : >> { %v2593_v61 = vpop.f32.mrf.mxu0  ;;  %1091 = vmatmul.f32.gmra.mxu2 %v1747_v58 }
 0x13c   : >> { %v487_v0 = vpop.f32.mrf.mxu1 }
 0x13d   : >> { %1340 = vmatmul.f32.gmra.mxu0 %v1814_v62  ;;  %v488_v4 = vadd.f32 %v487_v0, %v2484_v13  ;;  %1217 = vmatmul.f32.gmra.mxu3 %v1781_v63  ;;  %v595_v1 = vpop.f32.mrf.mxu2  ;;  %v1752_v0 = vld [vmem:[%s2061_s25 + $0x7d] sm:$0xff] }
 0x13f   : >> { %v637_v2 = vadd.f32 %v595_v1, %v488_v4  ;;  %965 = vmatmul.f32.gmra.mxu1 %v1745_v30 }
 0x140   : >> { %v721_v7 = vpop.f32.mrf.mxu3 }
 0x141   : >> { %v2599_v8 = vadd.f32 %v721_v7, %v637_v2  ;;  %v1786_v7 = vld [vmem:[%s2061_s25 + $0x7e] sm:$0xff] }
 0x142   : >> { %v2601_v9 = vpop.f32.mrf.mxu0  ;;  %1094 = vmatmul.f32.gmra.mxu2 %v1748_v6 }
 0x144   : >> { %v490_v14 = vpop.f32.mrf.mxu1 }
 0x145   : >> { %1343 = vmatmul.f32.gmra.mxu0 %v1815_v10  ;;  %v491_v13 = vadd.f32 %v490_v14, %v2502_v22  ;;  %1220 = vmatmul.f32.gmra.mxu3 %v1782_v11  ;;  %v598_v15 = vpop.f32.mrf.mxu2 }
 0x147   : >> { %v638_v16 = vadd.f32 %v598_v15, %v491_v13  ;;  %968 = vmatmul.f32.gmra.mxu1 %v1746_v45  ;;  %v1753_v13 = vld [vmem:[%s2061_s25 + $0x85] sm:$0xff] }
 0x148   : >> { %v724_v21 = vpop.f32.mrf.mxu3 }
 0x149   : >> { %v2607_v23 = vadd.f32 %v724_v21, %v638_v16  ;;  %v1820_v21 = vld [vmem:[%s2061_s25 + $0x7f] sm:$0xff] }
 0x14a   : >> { %v2609_v24 = vpop.f32.mrf.mxu0  ;;  %1097 = vmatmul.f32.gmra.mxu2 %v1749_v20 }
 0x14c   : >> { %v493_v28 = vpop.f32.mrf.mxu1 }
 0x14d   : >> { %1346 = vmatmul.f32.gmra.mxu0 %v1816_v26  ;;  %v494_v22 = vadd.f32 %v493_v28, %v2524_v34  ;;  %1223 = vmatmul.f32.gmra.mxu3 %v1783_v27  ;;  %v601_v30 = vpop.f32.mrf.mxu2  ;;  %v1787_v26 = vld [vmem:[%s2061_s25 + $0x86] sm:$0xff] }
 0x14f   : >> { %v639_v31 = vadd.f32 %v601_v30, %v494_v22  ;;  %971 = vmatmul.f32.gmra.mxu1 %v1747_v58  ;;  %v1785_v58 = vld [vmem:[%s2061_s25 + $0x76] sm:$0xff]  ;;  %v1754_v30 = vld [vmem:[%s2061_s25 + $0x8d] sm:$0xff] }
 0x150   : >> { %v727_v37 = vpop.f32.mrf.mxu3 }
 0x151   : >> { %v2615_v39 = vadd.f32 %v727_v37, %v639_v31 }
 0x152   : >> { %v2617_v40 = vpop.f32.mrf.mxu0  ;;  %1100 = vmatmul.f32.gmra.mxu2 %v1750_v35 }
 0x154   : >> { %v496_v45 = vpop.f32.mrf.mxu1 }
 0x155   : >> { %1349 = vmatmul.f32.gmra.mxu0 %v1817_v41  ;;  %v497_v34 = vadd.f32 %v496_v45, %v2537_v43  ;;  %1226 = vmatmul.f32.gmra.mxu3 %v1784_v42  ;;  %v604_v48 = vpop.f32.mrf.mxu2  ;;  %v1821_v41 = vld [vmem:[%s2061_s25 + $0x87] sm:$0xff] }
 0x156   : >> { %v1788_v42 = vld [vmem:[%s2061_s25 + $0x8e] sm:$0xff] }
 0x157   : >> { %v640_v51 = vadd.f32 %v604_v48, %v497_v34  ;;  %974 = vmatmul.f32.gmra.mxu1 %v1748_v6  ;;  %v1819_v6 = vld [vmem:[%s2061_s25 + $0x77] sm:$0xff] }
 0x158   : >> { %v730_v53 = vpop.f32.mrf.mxu3 }
 0x159   : >> { %v2623_v47 = vadd.f32 %v730_v53, %v640_v51 }
 0x15a   : >> { %v2625_v54 = vpop.f32.mrf.mxu0  ;;  %1103 = vmatmul.f32.gmra.mxu2 %v1751_v52 }
 0x15c   : >> { %v499_v59 = vpop.f32.mrf.mxu1 }
 0x15d   : >> { %1352 = vmatmul.f32.gmra.mxu0 %v1818_v55  ;;  %v500_v43 = vadd.f32 %v499_v59, %v2482_v12  ;;  %1229 = vmatmul.f32.gmra.mxu3 %v1785_v58  ;;  %v607_v62 = vpop.f32.mrf.mxu2  ;;  %v1822_v59 = vld [vmem:[%s2061_s25 + $0x8f] sm:$0xff] }
 0x15f   : >> { %v641_v63 = vadd.f32 %v607_v62, %v500_v43  ;;  %977 = vmatmul.f32.gmra.mxu1 %v1749_v20  ;;  %v1789_v43 = vld [vmem:[%s2061_s25 + $0x96] sm:$0xff] }
 0x160   : >> { %v733_v4 = vpop.f32.mrf.mxu3 }
 0x161   : >> { %v2631_v1 = vadd.f32 %v733_v4, %v641_v63 }
 0x162   : >> { %v2633_v2 = vpop.f32.mrf.mxu0  ;;  %1106 = vmatmul.f32.gmra.mxu2 %v1752_v0 }
 0x164   : >> { %v502_v10 = vpop.f32.mrf.mxu1 }
 0x165   : >> { %1355 = vmatmul.f32.gmra.mxu0 %v1819_v6  ;;  %v503_v12 = vadd.f32 %v502_v10, %v2506_v25  ;;  %1232 = vmatmul.f32.gmra.mxu3 %v1786_v7  ;;  %v610_v11 = vpop.f32.mrf.mxu2 }
 0x167   : >> { %v642_v14 = vadd.f32 %v610_v11, %v503_v12  ;;  %980 = vmatmul.f32.gmra.mxu1 %v1750_v35  ;;  %v1823_v11 = vld [vmem:[%s2061_s25 + $0x97] sm:$0xff] }
 0x168   : >> { %v736_v15 = vpop.f32.mrf.mxu3 }
 0x169   : >> { %v2639_v16 = vadd.f32 %v736_v15, %v642_v14  ;;  %v1790_v14 = vld [vmem:[%s2061_s25 + $0x9e] sm:$0xff] }
 0x16a   : >> { %v2641_v20 = vpop.f32.mrf.mxu0  ;;  %1109 = vmatmul.f32.gmra.mxu2 %v1753_v13 }
 0x16c   : >> { %v505_v27 = vpop.f32.mrf.mxu1 }
 0x16d   : >> { %1358 = vmatmul.f32.gmra.mxu0 %v1820_v21  ;;  %v506_v25 = vadd.f32 %v505_v27, %v2527_v36  ;;  %1235 = vmatmul.f32.gmra.mxu3 %v1787_v26  ;;  %v613_v28 = vpop.f32.mrf.mxu2 }
 0x16f   : >> { %v643_v22 = vadd.f32 %v613_v28, %v506_v25  ;;  %983 = vmatmul.f32.gmra.mxu1 %v1751_v52  ;;  %v1755_v52 = vld [vmem:[%s2061_s25 + $0x95] sm:$0xff] }
 0x170   : >> { %v739_v31 = vpop.f32.mrf.mxu3 }
 0x171   : >> { %v769_v35 = vadd.f32 %v739_v31, %v643_v22  ;;  %v1824_v31 = vld [vmem:[%s2061_s25 + $0x9f] sm:$0xff] }
 0x172   : >> { %v864_v37 = vpop.f32.mrf.mxu0  ;;  %1112 = vmatmul.f32.gmra.mxu2 %v1754_v30 }
 0x173   : >> { %v2649_v45 = vadd.f32 %v864_v37, %v769_v35  ;;  %v1791_v35 = vld [vmem:[%s2061_s25 + $0xa6] sm:$0xff] }
 0x174   : >> { %v508_v34 = vpop.f32.mrf.mxu1 }
 0x175   : >> { %1361 = vmatmul.f32.gmra.mxu0 %v1821_v41  ;;  %v509_v36 = vadd.f32 %v508_v34, %v2539_v44  ;;  %1238 = vmatmul.f32.gmra.mxu3 %v1788_v42  ;;  %v616_v48 = vpop.f32.mrf.mxu2 }
 0x177   : >> { %v644_v51 = vadd.f32 %v616_v48, %v509_v36  ;;  %986 = vmatmul.f32.gmra.mxu1 %v1752_v0  ;;  %v1756_v0 = vld [vmem:[%s2061_s25 + $0x9d] sm:$0xff] }
 0x178   : >> { %v742_v53 = vpop.f32.mrf.mxu3 }
 0x179   : >> { %v770_v55 = vadd.f32 %v742_v53, %v644_v51  ;;  %v1825_v53 = vld [vmem:[%s2061_s25 + $0xa7] sm:$0xff] }
 0x17a   : >> { %v867_v58 = vpop.f32.mrf.mxu0  ;;  %1115 = vmatmul.f32.gmra.mxu2 %v1755_v52 }
 0x17b   : >> { %v2655_v62 = vadd.f32 %v867_v58, %v770_v55  ;;  %v1792_v55 = vld [vmem:[%s2061_s25 + $0xae] sm:$0xff] }
 0x17c   : >> { %v511_v63 = vpop.f32.mrf.mxu1 }
 0x17d   : >> { %1364 = vmatmul.f32.gmra.mxu0 %v1822_v59  ;;  %v512_v44 = vadd.f32 %v511_v63, %v2494_v18  ;;  %1241 = vmatmul.f32.gmra.mxu3 %v1789_v43  ;;  %v619_v4 = vpop.f32.mrf.mxu2 }
 0x17f   : >> { %v645_v6 = vadd.f32 %v619_v4, %v512_v44  ;;  %989 = vmatmul.f32.gmra.mxu1 %v1753_v13  ;;  %v1757_v13 = vld [vmem:[%s2061_s25 + $0xa5] sm:$0xff] }
 0x180   : >> { %v745_v7 = vpop.f32.mrf.mxu3 }
 0x181   : >> { %v771_v10 = vadd.f32 %v745_v7, %v645_v6  ;;  %v1826_v7 = vld [vmem:[%s2061_s25 + $0xaf] sm:$0xff] }
 0x182   : >> { %v870_v12 = vpop.f32.mrf.mxu0  ;;  %1118 = vmatmul.f32.gmra.mxu2 %v1756_v0 }
 0x183   : >> { %v2661_v15 = vadd.f32 %v870_v12, %v771_v10  ;;  %v1793_v10 = vld [vmem:[%s2061_s25 + $0xb6] sm:$0xff]  ;;  %v882_v12 = vadd.f32 %v2552_v57, %v2550_v56  ;;  %v2687_v56 = vld [vmem:[%s2771_s4] ss:$0 sm:$0xff] }
 0x184   : >> { %v514_v21 = vpop.f32.mrf.mxu1  ;;  %v1827_v57 = vld [vmem:[%s2061_s25 + $0xb7] sm:$0xff] }
 0x185   : >> { %1367 = vmatmul.f32.gmra.mxu0 %v1823_v11  ;;  %v515_v18 = vadd.f32 %v514_v21, %v2515_v29  ;;  %1244 = vmatmul.f32.gmra.mxu3 %v1790_v14  ;;  %v622_v26 = vpop.f32.mrf.mxu2 }
 0x187   : >> { %v646_v27 = vadd.f32 %v622_v26, %v515_v18  ;;  %992 = vmatmul.f32.gmra.mxu1 %v1754_v30  ;;  %v1758_v30 = vld [vmem:[%s2061_s25 + $0xad] sm:$0xff]  ;;  %v1760_v18 = vld [vmem:[%s2061_s25 + $0xbd] sm:$0xff] }
 0x188   : >> { %v748_v25 = vpop.f32.mrf.mxu3 }
 0x189   : >> { %v772_v28 = vadd.f32 %v748_v25, %v646_v27 }
 0x18a   : >> { %v873_v22 = vpop.f32.mrf.mxu0  ;;  %1121 = vmatmul.f32.gmra.mxu2 %v1757_v13 }
 0x18b   : >> { %v2667_v37 = vadd.f32 %v873_v22, %v772_v28  ;;  %v1794_v28 = vld [vmem:[%s2061_s25 + $0xbe] sm:$0xff]  ;;  %v883_v22 = vadd.f32 %v2561_v5, %v2559_v3  ;;  %v884_v5 = vadd.f32 %v2569_v19, %v2567_v17 }
 0x18c   : >> { %v517_v41 = vpop.f32.mrf.mxu1  ;;  %v1828_v3 = vld [vmem:[%s2061_s25 + $0xbf] sm:$0xff] }
 0x18d   : >> { %1370 = vmatmul.f32.gmra.mxu0 %v1824_v31  ;;  %v518_v29 = vadd.f32 %v517_v41, %v2530_v38  ;;  %1247 = vmatmul.f32.gmra.mxu3 %v1791_v35  ;;  %v625_v42 = vpop.f32.mrf.mxu2 }
 0x18f   : >> { %v647_v34 = vadd.f32 %v625_v42, %v518_v29  ;;  %995 = vmatmul.f32.gmra.mxu1 %v1755_v52  ;;  %v1759_v52 = vld [vmem:[%s2061_s25 + $0xb5] sm:$0xff] }
 0x190   : >> { %v751_v36 = vpop.f32.mrf.mxu3 }
 0x191   : >> { %v773_v48 = vadd.f32 %v751_v36, %v647_v34 }
 0x192   : >> { %v876_v51 = vpop.f32.mrf.mxu0  ;;  %1124 = vmatmul.f32.gmra.mxu2 %v1758_v30 }
 0x193   : >> { %v2673_v58 = vadd.f32 %v876_v51, %v773_v48 }
 0x194   : >> { %v520_v59 = vpop.f32.mrf.mxu1 }
 0x195   : >> { %1373 = vmatmul.f32.gmra.mxu0 %v1825_v53  ;;  %v521_v38 = vadd.f32 %v520_v59, %v2542_v46  ;;  %1250 = vmatmul.f32.gmra.mxu3 %v1792_v55  ;;  %v628_v43 = vpop.f32.mrf.mxu2 }
 0x197   : >> { %v648_v63 = vadd.f32 %v628_v43, %v521_v38  ;;  %998 = vmatmul.f32.gmra.mxu1 %v1756_v0 }
 0x198   : >> { %v754_v44 = vpop.f32.mrf.mxu3 }
 0x199   : >> { %v774_v4 = vadd.f32 %v754_v44, %v648_v63  ;;  %v885_v44 = vadd.f32 %v2577_v33, %v2575_v32 }
 0x19a   : >> { %v879_v6 = vpop.f32.mrf.mxu0  ;;  %1127 = vmatmul.f32.gmra.mxu2 %v1759_v52 }
 0x19b   : >> { %v2681_v11 = vadd.f32 %v879_v6, %v774_v4 }
 0x19c   : >> { %v954_v46 = vpop.f32.mrf.mxu1 }
 0x19d   : >> { %1376 = vmatmul.f32.gmra.mxu0 %v1826_v7  ;;  %v1008_v0 = vadd.f32 %v954_v46, %v882_v12  ;;  %1253 = vmatmul.f32.gmra.mxu3 %v1793_v10  ;;  %v1080_v14 = vpop.f32.mrf.mxu2 }
 0x19f   : >> { %v1134_v21 = vadd.f32 %v1080_v14, %v1008_v0  ;;  %1001 = vmatmul.f32.gmra.mxu1 %v1757_v13  ;;  %v886_v14 = vadd.f32 %v2585_v50, %v2583_v49 }
 0x1a0   : >> { %v1206_v26 = vpop.f32.mrf.mxu3 }
 0x1a1   : >> { %v1260_v27 = vadd.f32 %v1206_v26, %v1134_v21 }
 0x1a2   : >> { %v1332_v25 = vpop.f32.mrf.mxu0  ;;  %1130 = vmatmul.f32.gmra.mxu2 %v1760_v18 }
 0x1a3   : >> { %v1386_v31 = vadd.f32 %v1332_v25, %v1260_v27 }
 0x1a4   : >> { %v957_v13 = vpop.f32.mrf.mxu1 }
 0x1a5   : >> { %1379 = vmatmul.f32.gmra.mxu0 %v1827_v57  ;;  %v1408_v35 = vadd.f32 %v2687_v56, %v1386_v31  ;;  %v1009_v41 = vadd.f32 %v957_v13, %v883_v22  ;;  %1256 = vmatmul.f32.gmra.mxu3 %v1794_v28  ;;  %v1083_v29 = vpop.f32.mrf.mxu2  ;;  %v887_v22 = vadd.f32 %v2593_v61, %v2591_v60 }
 0x1a7   : >> { %1427 = vst [vmem:[%s2696_s23] sm:$0xff] %v1408_v35  ;;  %v1135_v42 = vadd.f32 %v1083_v29, %v1009_v41  ;;  %1004 = vmatmul.f32.gmra.mxu1 %v1758_v30 }
 0x1a8   : >> { %v1209_v34 = vpop.f32.mrf.mxu3 }
 0x1a9   : >> { %v1261_v36 = vadd.f32 %v1209_v34, %v1135_v42 }
 0x1aa   : >> { %v1335_v48 = vpop.f32.mrf.mxu0 }
 0x1ab   : >> { %v1387_v51 = vadd.f32 %v1335_v48, %v1261_v36  ;;  %v888_v36 = vadd.f32 %v2601_v9, %v2599_v8 }
 0x1ac   : >> { %v960_v53 = vpop.f32.mrf.mxu1 }
 0x1ad   : >> { %1382 = vmatmul.f32.gmra.mxu0 %v1828_v3  ;;  %v1409_v55 = vadd.f32 %v2687_v56, %v1387_v51  ;;  %v1010_v59 = vadd.f32 %v960_v53, %v884_v5  ;;  %v1086_v38 = vpop.f32.mrf.mxu2 }
 0x1af   : >> { %1428 = vst [vmem:[%s2696_s23 + $0x8] sm:$0xff] %v1409_v55  ;;  %v1136_v43 = vadd.f32 %v1086_v38, %v1010_v59  ;;  %v889_v38 = vadd.f32 %v2609_v24, %v2607_v23 }
 0x1b0   : >> { %v1212_v63 = vpop.f32.mrf.mxu3 }
 0x1b1   : >> { %v1262_v52 = vadd.f32 %v1212_v63, %v1136_v43 }
 0x1b2   : >> { %v1338_v30 = vpop.f32.mrf.mxu0 }
 0x1b3   : >> { %v1388_v4 = vadd.f32 %v1338_v30, %v1262_v52 }
 0x1b4   : >> { %v963_v6 = vpop.f32.mrf.mxu1 }
 0x1b5   : >> { %v1410_v17 = vadd.f32 %v2687_v56, %v1388_v4  ;;  %v1011_v19 = vadd.f32 %v963_v6, %v885_v44  ;;  %v1089_v7 = vpop.f32.mrf.mxu2 }
 0x1b7   : >> { %1429 = vst [vmem:[%s2696_s23 + $0x10] sm:$0xff] %v1410_v17  ;;  %v1137_v10 = vadd.f32 %v1089_v7, %v1011_v19  ;;  %v890_v17 = vadd.f32 %v2617_v40, %v2615_v39 }
 0x1b8   : >> { %v1215_v12 = vpop.f32.mrf.mxu3 }
 0x1b9   : >> { %v1263_v46 = vadd.f32 %v1215_v12, %v1137_v10 }
 0x1ba   : >> { %v1341_v0 = vpop.f32.mrf.mxu0 }
 0x1bb   : >> { %v1389_v21 = vadd.f32 %v1341_v0, %v1263_v46 }
 0x1bc   : >> { %v966_v18 = vpop.f32.mrf.mxu1 }
 0x1bd   : >> { %v1411_v32 = vadd.f32 %v2687_v56, %v1389_v21  ;;  %v1012_v33 = vadd.f32 %v966_v18, %v886_v14  ;;  %v1092_v26 = vpop.f32.mrf.mxu2  ;;  %v891_v21 = vadd.f32 %v2625_v54, %v2623_v47 }
 0x1bf   : >> { %1430 = vst [vmem:[%s2696_s23 + $0x18] sm:$0xff] %v1411_v32  ;;  %v1138_v27 = vadd.f32 %v1092_v26, %v1012_v33 }
 0x1c0   : >> { %v1218_v25 = vpop.f32.mrf.mxu3 }
 0x1c1   : >> { %v1264_v57 = vadd.f32 %v1218_v25, %v1138_v27 }
 0x1c2   : >> { %v1344_v28 = vpop.f32.mrf.mxu0 }
 0x1c3   : >> { %v1390_v31 = vadd.f32 %v1344_v28, %v1264_v57  ;;  %v892_v28 = vadd.f32 %v2633_v2, %v2631_v1 }
 0x1c4   : >> { %v969_v13 = vpop.f32.mrf.mxu1 }
 0x1c5   : >> { %v1412_v49 = vadd.f32 %v2687_v56, %v1390_v31  ;;  %v1013_v50 = vadd.f32 %v969_v13, %v887_v22  ;;  %v1095_v35 = vpop.f32.mrf.mxu2 }
 0x1c7   : >> { %1431 = vst [vmem:[%s2696_s23 + $0x20] sm:$0xff] %v1412_v49  ;;  %v1139_v41 = vadd.f32 %v1095_v35, %v1013_v50 }
 0x1c8   : >> { %v1221_v29 = vpop.f32.mrf.mxu3 }
 0x1c9   : >> { %v1265_v42 = vadd.f32 %v1221_v29, %v1139_v41  ;;  %v893_v29 = vadd.f32 %v2641_v20, %v2639_v16 }
 0x1ca   : >> { %v1347_v34 = vpop.f32.mrf.mxu0 }
 0x1cb   : >> { %v1391_v48 = vadd.f32 %v1347_v34, %v1265_v42 }
 0x1cc   : >> { %v972_v3 = vpop.f32.mrf.mxu1 }
 0x1cd   : >> { %v1413_v60 = vadd.f32 %v2687_v56, %v1391_v48  ;;  %v1014_v61 = vadd.f32 %v972_v3, %v888_v36  ;;  %v1098_v5 = vpop.f32.mrf.mxu2 }
 0x1cf   : >> { %1432 = vst [vmem:[%s2696_s23 + $0x28] sm:$0xff] %v1413_v60  ;;  %v1140_v51 = vadd.f32 %v1098_v5, %v1014_v61 }
 0x1d0   : >> { %v1224_v53 = vpop.f32.mrf.mxu3 }
 0x1d1   : >> { %v1266_v55 = vadd.f32 %v1224_v53, %v1140_v51 }
 0x1d2   : >> { %v1350_v59 = vpop.f32.mrf.mxu0 }
 0x1d3   : >> { %v1392_v43 = vadd.f32 %v1350_v59, %v1266_v55 }
 0x1d4   : >> { %v975_v63 = vpop.f32.mrf.mxu1 }
 0x1d5   : >> { %v1414_v8 = vadd.f32 %v2687_v56, %v1392_v43  ;;  %v1015_v9 = vadd.f32 %v975_v63, %v889_v38  ;;  %v1101_v52 = vpop.f32.mrf.mxu2 }
 0x1d7   : >> { %1433 = vst [vmem:[%s2696_s23 + $0x30] sm:$0xff] %v1414_v8  ;;  %v1141_v30 = vadd.f32 %v1101_v52, %v1015_v9 }
 0x1d8   : >> { %v1227_v44 = vpop.f32.mrf.mxu3 }
 0x1d9   : >> { %v1267_v4 = vadd.f32 %v1227_v44, %v1141_v30 }
 0x1da   : >> { %v1353_v6 = vpop.f32.mrf.mxu0 }
 0x1db   : >> { %v1393_v19 = vadd.f32 %v1353_v6, %v1267_v4 }
 0x1dc   : >> { %v978_v7 = vpop.f32.mrf.mxu1 }
 0x1dd   : >> { %v1415_v23 = vadd.f32 %v2687_v56, %v1393_v19  ;;  %v1016_v24 = vadd.f32 %v978_v7, %v890_v17  ;;  %v1104_v10 = vpop.f32.mrf.mxu2 }
 0x1df   : >> { %1434 = vst [vmem:[%s2696_s23 + $0x38] sm:$0xff] %v1415_v23  ;;  %v1142_v12 = vadd.f32 %v1104_v10, %v1016_v24 }
 0x1e0   : >> { %v1230_v46 = vpop.f32.mrf.mxu3 }
 0x1e1   : >> { %v1268_v0 = vadd.f32 %v1230_v46, %v1142_v12 }
 0x1e2   : >> { %v1356_v14 = vpop.f32.mrf.mxu0 }
 0x1e3   : >> { %v1394_v18 = vadd.f32 %v1356_v14, %v1268_v0 }
 0x1e4   : >> { %v981_v32 = vpop.f32.mrf.mxu1 }
 0x1e5   : >> { %v1416_v39 = vadd.f32 %v2687_v56, %v1394_v18  ;;  %v1017_v40 = vadd.f32 %v981_v32, %v891_v21  ;;  %v1107_v33 = vpop.f32.mrf.mxu2 }
 0x1e7   : >> { %1435 = vst [vmem:[%s2696_s23 + $0x40] sm:$0xff] %v1416_v39  ;;  %v1143_v26 = vadd.f32 %v1107_v33, %v1017_v40 }
 0x1e8   : >> { %v1233_v27 = vpop.f32.mrf.mxu3 }
 0x1e9   : >> { %v1269_v25 = vadd.f32 %v1233_v27, %v1143_v26 }
 0x1ea   : >> { %v1359_v57 = vpop.f32.mrf.mxu0 }
 0x1eb   : >> { %v1395_v22 = vadd.f32 %v1359_v57, %v1269_v25 }
 0x1ec   : >> { %v984_v31 = vpop.f32.mrf.mxu1 }
 0x1ed   : >> { %v1417_v47 = vadd.f32 %v2687_v56, %v1395_v22  ;;  %v1018_v54 = vadd.f32 %v984_v31, %v892_v28  ;;  %v1110_v13 = vpop.f32.mrf.mxu2 }
 0x1ef   : >> { %1436 = vst [vmem:[%s2696_s23 + $0x48] sm:$0xff] %v1417_v47  ;;  %v1144_v49 = vadd.f32 %v1110_v13, %v1018_v54 }
 0x1f0   : >> { %v1236_v50 = vpop.f32.mrf.mxu3 }
 0x1f1   : >> { %v1270_v35 = vadd.f32 %v1236_v50, %v1144_v49 }
 0x1f2   : >> { %v1362_v41 = vpop.f32.mrf.mxu0 }
 0x1f3   : >> { %v1396_v42 = vadd.f32 %v1362_v41, %v1270_v35 }
 0x1f4   : >> { %v987_v34 = vpop.f32.mrf.mxu1 }
 0x1f5   : >> { %v1418_v1 = vadd.f32 %v2687_v56, %v1396_v42  ;;  %v1019_v2 = vadd.f32 %v987_v34, %v893_v29  ;;  %v1113_v36 = vpop.f32.mrf.mxu2 }
 0x1f7   : >> { %1437 = vst [vmem:[%s2696_s23 + $0x50] sm:$0xff] %v1418_v1  ;;  %v1145_v48 = vadd.f32 %v1113_v36, %v1019_v2 }
 0x1f8   : >> { %v1239_v3 = vpop.f32.mrf.mxu3 }
 0x1f9   : >> { %v1271_v60 = vadd.f32 %v1239_v3, %v1145_v48 }
 0x1fa   : >> { %v1365_v61 = vpop.f32.mrf.mxu0 }
 0x1fb   : >> { %v1397_v5 = vadd.f32 %v1365_v61, %v1271_v60 }
 0x1fc   : >> { %v990_v51 = vpop.f32.mrf.mxu1 }
 0x1fd   : >> { %v1419_v53 = vadd.f32 %v2687_v56, %v1397_v5  ;;  %v1020_v55 = vadd.f32 %v990_v51, %v2649_v45  ;;  %v1116_v16 = vpop.f32.mrf.mxu2 }
 0x1ff   : >> { %1438 = vst [vmem:[%s2696_s23 + $0x58] sm:$0xff] %v1419_v53  ;;  %v1146_v20 = vadd.f32 %v1116_v16, %v1020_v55 }
 0x200   : >> { %v1242_v59 = vpop.f32.mrf.mxu3 }
 0x201   : >> { %v1272_v38 = vadd.f32 %v1242_v59, %v1146_v20 }
 0x202   : >> { %v1368_v43 = vpop.f32.mrf.mxu0 }
 0x203   : >> { %v1398_v63 = vadd.f32 %v1368_v43, %v1272_v38 }
 0x204   : >> { %v993_v8 = vpop.f32.mrf.mxu1 }
 0x205   : >> { %v1420_v9 = vadd.f32 %v2687_v56, %v1398_v63  ;;  %v1021_v52 = vadd.f32 %v993_v8, %v2655_v62  ;;  %v1119_v30 = vpop.f32.mrf.mxu2 }
 0x207   : >> { %1439 = vst [vmem:[%s2696_s23 + $0x60] sm:$0xff] %v1420_v9  ;;  %v1147_v44 = vadd.f32 %v1119_v30, %v1021_v52 }
 0x208   : >> { %v1245_v4 = vpop.f32.mrf.mxu3 }
 0x209   : >> { %v1273_v6 = vadd.f32 %v1245_v4, %v1147_v44 }
 0x20a   : >> { %v1371_v17 = vpop.f32.mrf.mxu0 }
 0x20b   : >> { %v1399_v45 = vadd.f32 %v1371_v17, %v1273_v6 }
 0x20c   : >> { %v996_v19 = vpop.f32.mrf.mxu1 }
 0x20d   : >> { %v1421_v7 = vadd.f32 %v2687_v56, %v1399_v45  ;;  %v1022_v23 = vadd.f32 %v996_v19, %v2661_v15  ;;  %v1122_v24 = vpop.f32.mrf.mxu2 }
 0x20f   : >> { %1440 = vst [vmem:[%s2696_s23 + $0x68] sm:$0xff] %v1421_v7  ;;  %v1148_v10 = vadd.f32 %v1122_v24, %v1022_v23 }
 0x210   : >> { %v1248_v12 = vpop.f32.mrf.mxu3 }
 0x211   : >> { %v1274_v46 = vadd.f32 %v1248_v12, %v1148_v10 }
 0x212   : >> { %v1374_v0 = vpop.f32.mrf.mxu0 }
 0x213   : >> { %v1400_v62 = vadd.f32 %v1374_v0, %v1274_v46 }
 0x214   : >> { %v999_v14 = vpop.f32.mrf.mxu1 }
 0x215   : >> { %v1422_v21 = vadd.f32 %v2687_v56, %v1400_v62  ;;  %v1023_v18 = vadd.f32 %v999_v14, %v2667_v37  ;;  %v1125_v32 = vpop.f32.mrf.mxu2 }
 0x217   : >> { %1441 = vst [vmem:[%s2696_s23 + $0x70] sm:$0xff] %v1422_v21  ;;  %v1149_v39 = vadd.f32 %v1125_v32, %v1023_v18 }
 0x218   : >> { %v1251_v40 = vpop.f32.mrf.mxu3 }
 0x219   : >> { %v1275_v33 = vadd.f32 %v1251_v40, %v1149_v39 }
 0x21a   : >> { %v1377_v26 = vpop.f32.mrf.mxu0 }
 0x21b   : >> { %v1401_v15 = vadd.f32 %v1377_v26, %v1275_v33 }
 0x21c   : >> { %v1002_v27 = vpop.f32.mrf.mxu1 }
 0x21d   : >> { %v1423_v25 = vadd.f32 %v2687_v56, %v1401_v15  ;;  %v1024_v57 = vadd.f32 %v1002_v27, %v2673_v58  ;;  %v1128_v28 = vpop.f32.mrf.mxu2 }
 0x21f   : >> { %1442 = vst [vmem:[%s2696_s23 + $0x78] sm:$0xff] %v1423_v25  ;;  %v1150_v22 = vadd.f32 %v1128_v28, %v1024_v57 }
 0x220   : >> { %v1254_v31 = vpop.f32.mrf.mxu3 }
 0x221   : >> { %v1276_v47 = vadd.f32 %v1254_v31, %v1150_v22 }
 0x222   : >> { %v1380_v37 = vpop.f32.mrf.mxu0 }
 0x223   : >> { %v1402_v54 = vadd.f32 %v1380_v37, %v1276_v47 }
 0x224   : >> { %v1005_v13 = vpop.f32.mrf.mxu1 }
 0x225   : >> { %v1424_v49 = vadd.f32 %v2687_v56, %v1402_v54  ;;  %v1025_v50 = vadd.f32 %v1005_v13, %v2681_v11  ;;  %v1131_v35 = vpop.f32.mrf.mxu2 }
 0x227   : >> { %1443 = vst [vmem:[%s2696_s23 + $0x80] sm:$0xff] %v1424_v49  ;;  %v1151_v41 = vadd.f32 %v1131_v35, %v1025_v50 }
 0x228   : >> { %v1257_v29 = vpop.f32.mrf.mxu3 }
 0x229   : >> { %v1277_v42 = vadd.f32 %v1257_v29, %v1151_v41 }
 0x22a   : >> { %v1383_v34 = vpop.f32.mrf.mxu0 }
 0x22b   : >> { %v1403_v58 = vadd.f32 %v1383_v34, %v1277_v42  ;;  %304 = sbr.rel (!%p302_p5) target bundleno = 68 (0x44), region = 115 }
 0x22d   : >> { %v1425_v1 = vadd.f32 %v2687_v56, %v1403_v58 }
 0x22f   : >> { %1444 = vst [vmem:[%s2696_s23 + $0x88] sm:$0xff] %v1425_v1 }
 0x230 PF: > { %s15_s18 = sadd.s32 1, %s1939_s18  }
 0x231   : > { %p12_p6 = scmp.ge.s32.totalorder %s15_s18, 4  }
 0x233   :  { %14 = sbr.rel (!%p12_p6) target bundleno = 1 (0x1), region = 126 }

</bundles_post_ra>
